<compile_context>
chip_gen: v7x
topology: tpu7x:2x2x1
jax: 0.10.0
libtpu: 0.0.40
codegen_flags: <defaults>
</compile_context>

<pallas_src>
import math
import functools

import jax
import jax.numpy as jnp
from jax.experimental import pallas as pl
from jax.experimental.pallas import tpu as pltpu

EPS = 1e-6
NEG_INF = -1.0e9
COMPUTE_DTYPE = jnp.bfloat16          # MXU operand dtype (set to jnp.float32 for exact f32 math)
VMEM_LIMIT = 48 * 1024 * 1024         # explicit scoped-VMEM budget (fits v7x's 64 MiB physical)

# Tile-size targets (re-derived per shape below; all << VMEM_LIMIT even double-buffered)
TM, TN, TK, TF, TQ, TKV = 256, 256, 512, 512, 256, 512


def _pick_tile(n, target, gran):
    """Largest tile <= target that divides n and is a multiple of `gran`
    (or the full dim if n <= target / no such divisor exists)."""
    if n <= target:
        return n
    for t in range(target, gran - 1, -1):
        if n % t == 0 and t % gran == 0:
            return t
    return n


# ----------------------------------------------------------------------------
# Kernels
# ----------------------------------------------------------------------------
def _layer_norm_f32(x, alpha, beta):
    """PyTorch LayerNormalization: alpha*(x-mean)/(std+eps)+beta, std ddof=1."""
    n = x.shape[-1]
    mean = jnp.mean(x, axis=-1, keepdims=True)
    d = x - mean
    var_unbiased = jnp.sum(d * d, axis=-1, keepdims=True) / (n - 1)
    std = jnp.sqrt(var_unbiased)
    return alpha * d / (std + EPS) + beta


def _ln_matmul_kernel(x_ref, w_ref, b_ref, a_ref, g_ref, o_ref, xn_ref, *, relu):
    """out[i, j] = LN(x[i, :]) @ W[:, j] + b[j].   grid = (M/tm, N/tn).
    LN (f32) is computed once per row-tile (j == 0) and cached in VMEM as bf16,
    so the normalized activation never round-trips HBM."""
    j = pl.program_id(1)

    @pl.when(j == 0)
    def _():
        x = x_ref[...].astype(jnp.float32)
        xn = _layer_norm_f32(x, a_ref[0, 0], g_ref[0, 0])
        xn_ref[...] = xn.astype(xn_ref.dtype)

    y = jnp.dot(xn_ref[...], w_ref[...].astype(COMPUTE_DTYPE),
                preferred_element_type=jnp.float32)
    y = y + b_ref[...].astype(jnp.float32)
    if relu:
        y = jnp.maximum(y, 0.0)
    o_ref[...] = y.astype(o_ref.dtype)


def _matmul_kernel(x_ref, w_ref, b_ref, *rest, relu, has_residual):
    """Tiled y = x @ W + b (+ residual).  grid = (M/tm, N/tn, K/tk), K last."""
    if has_residual:
        r_ref, o_ref, acc_ref = rest
    else:
        o_ref, acc_ref = rest
    k = pl.program_id(2)

    @pl.when(k == 0)
    def _():
        acc_ref[...] = jnp.zeros_like(acc_ref)

    acc_ref[...] += jnp.dot(x_ref[...].astype(COMPUTE_DTYPE),
                            w_ref[...].astype(COMPUTE_DTYPE),
                            preferred_element_type=jnp.float32)

    @pl.when(k == pl.num_programs(2) - 1)
    def _():
        y = acc_ref[...] + b_ref[...].astype(jnp.float32)
        if relu:
            y = jnp.maximum(y, 0.0)
        if has_residual:
            y = y + rest[0][...].astype(jnp.float32)   # residual fused in epilogue
        o_ref[...] = y.astype(o_ref.dtype)


def _ffn_kernel(x_ref, w1_ref, b1_ref, w2_ref, b2_ref, a_ref, g_ref,
                o_ref, xn_ref, acc_ref):
    """Fused residual FFN: out = x + ReLU(LN(x) @ W1 + b1) @ W2 + b2.
    grid = (M/tm, d_ff/tf).  The (tm, tf) hidden tile lives only in VMEM."""
    f = pl.program_id(1)

    @pl.when(f == 0)
    def _():
        x = x_ref[...].astype(jnp.float32)
        xn = _layer_norm_f32(x, a_ref[0, 0], g_ref[0, 0])
        xn_ref[...] = xn.astype(xn_ref.dtype)
        acc_ref[...] = jnp.zeros_like(acc_ref)

    h = jnp.dot(xn_ref[...], w1_ref[...].astype(COMPUTE_DTYPE),
                preferred_element_type=jnp.float32)
    h = jnp.maximum(h + b1_ref[...].astype(jnp.float32), 0.0)
    acc_ref[...] += jnp.dot(h.astype(COMPUTE_DTYPE),
                            w2_ref[...].astype(COMPUTE_DTYPE),
                            preferred_element_type=jnp.float32)

    @pl.when(f == pl.num_programs(1) - 1)
    def _():
        y = acc_ref[...] + b2_ref[...].astype(jnp.float32) \
            + x_ref[...].astype(jnp.float32)               # residual fused
        o_ref[...] = y.astype(o_ref.dtype)


def _flash_attn_kernel(mask_ref, q_ref, k_ref, v_ref, o_ref,
                       m_sc, l_sc, acc_sc, *, scale):
    """Flash-style attention for one batch (all heads), kv tiled on last axis.
    grid = (B, Sq/tq, Sk/tkv).  Online softmax in f32 scratch; normalization is
    deferred to the epilogue via pl.reciprocal(approx=True)."""
    kj = pl.program_id(2)

    @pl.when(kj == 0)
    def _():
        m_sc[...] = jnp.full_like(m_sc, -jnp.inf)
        l_sc[...] = jnp.zeros_like(l_sc)
        acc_sc[...] = jnp.zeros_like(acc_sc)

    q = (q_ref[0].astype(jnp.float32) * scale).astype(COMPUTE_DTYPE)   # (H, tq, dk)
    k = k_ref[0].astype(COMPUTE_DTYPE)                                 # (H, tkv, dk)
    v = v_ref[0].astype(COMPUTE_DTYPE)                                 # (H, tkv, dk)

    s = jnp.einsum('hqd,hkd->hqk', q, k,
                   preferred_element_type=jnp.float32)                 # (H, tq, tkv)
    s = jnp.where(mask_ref[...] == 0, NEG_INF, s)   # mask (1,tq,tkv) broadcasts over heads

    m_new = jnp.maximum(m_sc[...], jnp.max(s, axis=-1, keepdims=True))
    alpha = jnp.exp(m_sc[...] - m_new)
    p = jnp.exp(s - m_new)
    l_sc[...] = alpha * l_sc[...] + jnp.sum(p, axis=-1, keepdims=True)
    acc_sc[...] = alpha * acc_sc[...] + jnp.einsum(
        'hqk,hkd->hqd', p.astype(COMPUTE_DTYPE), v,
        preferred_element_type=jnp.float32)
    m_sc[...] = m_new

    @pl.when(kj == pl.num_programs(2) - 1)
    def _():
        o = acc_sc[...] * pl.reciprocal(l_sc[...], approx=True)
        o_ref[0] = o.astype(o_ref.dtype)


# ----------------------------------------------------------------------------
# Pallas wrappers
# ----------------------------------------------------------------------------
def ln_matmul(x2d, w, b, ln_a, ln_b, relu=False):
    M, D = x2d.shape
    N = w.shape[1]
    tm = _pick_tile(M, TM, 8)
    tn = _pick_tile(N, TN, 128)
    return pl.pallas_call(
        functools.partial(_ln_matmul_kernel, relu=relu),
        grid=(M // tm, N // tn),
        in_specs=[
            pl.BlockSpec((tm, D), lambda i, j: (i, 0)),
            pl.BlockSpec((D, tn), lambda i, j: (0, j)),
            pl.BlockSpec((1, tn), lambda i, j: (0, j)),
            pl.BlockSpec(memory_space=pltpu.MemorySpace.SMEM),   # LN alpha scalar
            pl.BlockSpec(memory_space=pltpu.MemorySpace.SMEM),   # LN bias scalar
        ],
        out_specs=pl.BlockSpec((tm, tn), lambda i, j: (i, j)),
        out_shape=jax.ShapeDtypeStruct((M, N), x2d.dtype),
        scratch_shapes=[pltpu.VMEM((tm, D), COMPUTE_DTYPE)],
        compiler_params=pltpu.CompilerParams(
            dimension_semantics=("parallel", "arbitrary"),
            vmem_limit_bytes=VMEM_LIMIT),
    )(x2d, w, b, ln_a, ln_b)


def matmul(x2d, w, b, residual=None, relu=False):
    M, K = x2d.shape
    N = w.shape[1]
    tm = _pick_tile(M, TM, 8)
    tn = _pick_tile(N, TN, 128)
    tk = _pick_tile(K, TK, 128)
    in_specs = [
        pl.BlockSpec((tm, tk), lambda i, j, kk: (i, kk)),
        pl.BlockSpec((tk, tn), lambda i, j, kk: (kk, j)),
        pl.BlockSpec((1, tn), lambda i, j, kk: (0, j)),
    ]
    args = [x2d, w, b]
    if residual is not None:
        in_specs.append(pl.BlockSpec((tm, tn), lambda i, j, kk: (i, j)))
        args.append(residual)
    return pl.pallas_call(
        functools.partial(_matmul_kernel, relu=relu,
                          has_residual=residual is not None),
        grid=(M // tm, N // tn, K // tk),
        in_specs=in_specs,
        out_specs=pl.BlockSpec((tm, tn), lambda i, j, kk: (i, j)),
        out_shape=jax.ShapeDtypeStruct((M, N), x2d.dtype),
        scratch_shapes=[pltpu.VMEM((tm, tn), jnp.float32)],
        compiler_params=pltpu.CompilerParams(
            dimension_semantics=("parallel", "parallel", "arbitrary"),
            vmem_limit_bytes=VMEM_LIMIT),
    )(*args)


def ffn_fused(x2d, w1, b1, w2, b2, ln_a, ln_b):
    M, D = x2d.shape
    F = w1.shape[1]
    tm = _pick_tile(M, TM, 8)
    tf = _pick_tile(F, TF, 128)
    return pl.pallas_call(
        _ffn_kernel,
        grid=(M // tm, F // tf),
        in_specs=[
            pl.BlockSpec((tm, D), lambda i, f: (i, 0)),
            pl.BlockSpec((D, tf), lambda i, f: (0, f)),
            pl.BlockSpec((1, tf), lambda i, f: (0, f)),
            pl.BlockSpec((tf, D), lambda i, f: (f, 0)),
            pl.BlockSpec((1, D), lambda i, f: (0, 0)),
            pl.BlockSpec(memory_space=pltpu.MemorySpace.SMEM),
            pl.BlockSpec(memory_space=pltpu.MemorySpace.SMEM),
        ],
        out_specs=pl.BlockSpec((tm, D), lambda i, f: (i, 0)),
        out_shape=jax.ShapeDtypeStruct((M, D), x2d.dtype),
        scratch_shapes=[pltpu.VMEM((tm, D), COMPUTE_DTYPE),
                        pltpu.VMEM((tm, D), jnp.float32)],
        compiler_params=pltpu.CompilerParams(
            dimension_semantics=("parallel", "arbitrary"),
            vmem_limit_bytes=VMEM_LIMIT),
    )(x2d, w1, b1, w2, b2, ln_a, ln_b)


def flash_attention(q, k, v, mask):
    """q: (B,H,Sq,dk)  k,v: (B,H,Sk,dk)  mask: (1|B, 1, Sq|1, Sk) with 1=keep."""
    B, H, Sq, dk = q.shape
    Sk = k.shape[2]
    mask = jnp.asarray(mask, jnp.float32)
    mb = mask.shape[0]
    # Collapse head dim only (it is size 1); no per-head / per-batch broadcast to HBM.
    mask3 = jnp.broadcast_to(mask, (mb, 1, Sq, Sk)).reshape(mb, Sq, Sk)
    mask_idx = (lambda b, qi, kj: (b, qi, kj)) if mb > 1 else \
               (lambda b, qi, kj: (0, qi, kj))

    tq = _pick_tile(Sq, TQ, 8)
    tkv = _pick_tile(Sk, TKV, 128)
    return pl.pallas_call(
        functools.partial(_flash_attn_kernel, scale=1.0 / math.sqrt(dk)),
        grid=(B, Sq // tq, Sk // tkv),
        in_specs=[
            pl.BlockSpec((1, tq, tkv), mask_idx),
            pl.BlockSpec((1, H, tq, dk), lambda b, qi, kj: (b, 0, qi, 0)),
            pl.BlockSpec((1, H, tkv, dk), lambda b, qi, kj: (b, 0, kj, 0)),
            pl.BlockSpec((1, H, tkv, dk), lambda b, qi, kj: (b, 0, kj, 0)),
        ],
        out_specs=pl.BlockSpec((1, H, tq, dk), lambda b, qi, kj: (b, 0, qi, 0)),
        out_shape=jax.ShapeDtypeStruct((B, H, Sq, dk), q.dtype),
        scratch_shapes=[pltpu.VMEM((H, tq, 1), jnp.float32),
                        pltpu.VMEM((H, tq, 1), jnp.float32),
                        pltpu.VMEM((H, tq, dk), jnp.float32)],
        compiler_params=pltpu.CompilerParams(
            dimension_semantics=("parallel", "parallel", "arbitrary"),
            vmem_limit_bytes=VMEM_LIMIT),
    )(mask3, q, k, v)


# ----------------------------------------------------------------------------
# Decoder block forward
# ----------------------------------------------------------------------------
def decoder_block_forward(params, x, encoder_output, src_mask, tgt_mask, h):
    B, Sq, D = x.shape
    Sk = encoder_output.shape[1]
    dk = D // h
    x2d = x.reshape(B * Sq, D)
    enc2d = encoder_output.reshape(B * Sk, D)

    # --- residual 0: pre-norm self-attention (LN fused into the QKV matmul) ---
    sa = params["self_attn"]
    qkv = ln_matmul(x2d, sa["wqkv"], sa["bqkv"], params["ln0_a"], params["ln0_b"])
    qkv = qkv.reshape(B, Sq, 3, h, dk).transpose(2, 0, 3, 1, 4)   # (3,B,H,Sq,dk)
    attn = flash_attention(qkv[0], qkv[1], qkv[2], tgt_mask)      # (B,H,Sq,dk)
    attn2d = attn.transpose(0, 2, 1, 3).reshape(B * Sq, D)
    x2d = matmul(attn2d, sa["wo"], sa["bo"], residual=x2d)        # +x fused

    # --- residual 1: pre-norm cross-attention (LN only on the query input) ---
    ca = params["cross_attn"]
    qc = ln_matmul(x2d, ca["wq"], ca["bq"], params["ln1_a"], params["ln1_b"])
    kvc = matmul(enc2d, ca["wkv"], ca["bkv"])                     # encoder K/V, no LN
    qc = qc.reshape(B, Sq, h, dk).transpose(0, 2, 1, 3)
    kvc = kvc.reshape(B, Sk, 2, h, dk).transpose(2, 0, 3, 1, 4)   # (2,B,H,Sk,dk)
    attn = flash_attention(qc, kvc[0], kvc[1], src_mask)
    attn2d = attn.transpose(0, 2, 1, 3).reshape(B * Sq, D)
    x2d = matmul(attn2d, ca["wo"], ca["bo"], residual=x2d)        # +x fused

    # --- residual 2: pre-norm feed-forward, fully fused ---
    # TODO(synk): the reference passes the FeedForwardBlock *class* here (a bug
    # that would raise in PyTorch); implemented with the feed-forward instance
    # as clearly intended.
    f = params["ffn"]
    x2d = ffn_fused(x2d, f["w1"], f["b1"], f["w2"], f["b2"],
                    params["ln2_a"], params["ln2_b"])
    return x2d.reshape(B, Sq, D)


# ----------------------------------------------------------------------------
# Deterministic parameter construction (PyTorch nn.Linear-style init)
# ----------------------------------------------------------------------------
def _init_linear(key, d_in, d_out):
    kw, kb = jax.random.split(key)
    bound = 1.0 / math.sqrt(d_in)
    w = jax.random.uniform(kw, (d_in, d_out), jnp.float32, -bound, bound)
    b = jax.random.uniform(kb, (1, d_out), jnp.float32, -bound, bound)
    # weights stored bf16 (halves HBM/VMEM weight traffic); biases stay f32
    return w.astype(COMPUTE_DTYPE), b


def make_params(key, d_model, d_ff, h):
    keys = jax.random.split(key, 10)
    wq, bq = _init_linear(keys[0], d_model, d_model)
    wk, bk = _init_linear(keys[1], d_model, d_model)
    wv, bv = _init_linear(keys[2], d_model, d_model)
    wo, bo = _init_linear(keys[3], d_model, d_model)
    sa = {"wqkv": jnp.concatenate([wq, wk, wv], axis=1),
          "bqkv": jnp.concatenate([bq, bk, bv], axis=1),
          "wo": wo, "bo": bo}
    wq, bq = _init_linear(keys[4], d_model, d_model)
    wk, bk = _init_linear(keys[5], d_model, d_model)
    wv, bv = _init_linear(keys[6], d_model, d_model)
    wo, bo = _init_linear(keys[7], d_model, d_model)
    ca = {"wq": wq, "bq": bq,
          "wkv": jnp.concatenate([wk, wv], axis=1),
          "bkv": jnp.concatenate([bk, bv], axis=1),
          "wo": wo, "bo": bo}
    w1, b1 = _init_linear(keys[8], d_model, d_ff)
    w2, b2 = _init_linear(keys[9], d_ff, d_model)
    one = jnp.ones((1, 1), jnp.float32)  # LayerNormalization: alpha=1, bias=1
    return {"self_attn": sa, "cross_attn": ca,
            "ffn": {"w1": w1, "b1": b1, "w2": w2, "b2": b2},
            "ln0_a": one, "ln0_b": one,
            "ln1_a": one, "ln1_b": one,
            "ln2_a": one, "ln2_b": one}


# ----------------------------------------------------------------------------
# Pure-JAX reference (mirrors the mixed-precision policy of the kernels)
# ----------------------------------------------------------------------------
def _reference_forward(params, x, enc, src_mask, tgt_mask, h):
    CD = COMPUTE_DTYPE

    def ln(z, a, g):
        return _layer_norm_f32(z, a[0, 0], g[0, 0])

    def mm(a, w, b):
        return jnp.dot(a.astype(CD), w.astype(CD),
                       preferred_element_type=jnp.float32) + b

    def attn(q, k, v, mask, dk):
        qs = (q * (1.0 / math.sqrt(dk))).astype(CD)
        s = jnp.einsum('bhqd,bhkd->bhqk', qs, k.astype(CD),
                       preferred_element_type=jnp.float32)
        s = jnp.where(mask == 0, NEG_INF, s)
        p = jax.nn.softmax(s, axis=-1)
        return jnp.einsum('bhqk,bhkd->bhqd', p.astype(CD), v.astype(CD),
                          preferred_element_type=jnp.float32)

    B, Sq, D = x.shape
    Sk = enc.shape[1]
    dk = D // h
    sa = params["self_attn"]
    n0 = ln(x, params["ln0_a"], params["ln0_b"])
    qkv = mm(n0, sa["wqkv"], sa["bqkv"]).reshape(B, Sq, 3, h, dk).transpose(2, 0, 3, 1, 4)
    a0 = attn(qkv[0], qkv[1], qkv[2], tgt_mask, dk).transpose(0, 2, 1, 3).reshape(B, Sq, D)
    x = x + mm(a0, sa["wo"], sa["bo"])
    ca = params["cross_attn"]
    n1 = ln(x, params["ln1_a"], params["ln1_b"])
    qc = mm(n1, ca["wq"], ca["bq"]).reshape(B, Sq, h, dk).transpose(0, 2, 1, 3)
    kv = mm(enc, ca["wkv"], ca["bkv"]).reshape(B, Sk, 2, h, dk).transpose(2, 0, 3, 1, 4)
    a1 = attn(qc, kv[0], kv[1], src_mask, dk).transpose(0, 2, 1, 3).reshape(B, Sq, D)
    x = x + mm(a1, ca["wo"], ca["bo"])
    f = params["ffn"]
    n2 = ln(x, params["ln2_a"], params["ln2_b"])
    h1 = jnp.maximum(mm(n2, f["w1"], f["b1"]), 0.0)
    return x + mm(h1, f["w2"], f["b2"])


# ----------------------------------------------------------------------------
if __name__ == "__main__":
    B, S_TGT, S_SRC = 2, 8, 8
    D_MODEL, D_FF, H = 32, 64, 4

    key = jax.random.PRNGKey(0)
    k_par, k_x, k_enc = jax.random.split(key, 3)

    params = make_params(k_par, D_MODEL, D_FF, H)
    x = jax.random.normal(k_x, (B, S_TGT, D_MODEL), jnp.float32)
    enc_out = jax.random.normal(k_enc, (B, S_SRC, D_MODEL), jnp.float32)

    # masks: 1 = keep, 0 = masked (filled with -1e9 pre-softmax)
    tgt_mask = jnp.tril(jnp.ones((S_TGT, S_TGT), jnp.float32))[None, None]  # causal
    src_mask = jnp.ones((1, 1, S_TGT, S_SRC), jnp.float32)

    fwd = jax.jit(functools.partial(decoder_block_forward, h=H))
    out = jax.block_until_ready(fwd(params, x, enc_out, src_mask, tgt_mask))

    ref = _reference_forward(params, x, enc_out, src_mask, tgt_mask, H)

    assert out.shape == (B, S_TGT, D_MODEL)
    assert bool(jnp.all(jnp.isfinite(out)))
    assert bool(jnp.allclose(out, ref, atol=5e-2, rtol=5e-2)), \
        float(jnp.max(jnp.abs(out - ref)))
    print("KERNEL_OK")
</pallas_src>

<mosaic_0001>
module attributes {stable_mosaic.version = 11 : i64} {
  func.func @_ln_matmul_kernel(%arg0: i32, %arg1: i32, %arg2: memref<16x32xf32, #tpu.memory_space<vmem>>, %arg3: memref<32x96xbf16, #tpu.memory_space<vmem>>, %arg4: memref<1x96xf32, #tpu.memory_space<vmem>>, %arg5: memref<1x1xf32, #tpu.memory_space<smem>>, %arg6: memref<1x1xf32, #tpu.memory_space<smem>>, %arg7: memref<16x96xf32, #tpu.memory_space<vmem>>, %arg8: memref<16x32xbf16, #tpu.memory_space<vmem>>) attributes {dimension_semantics = [#tpu.dimension_semantics<parallel>, #tpu.dimension_semantics<arbitrary>], iteration_bounds = array<i64: 1, 1>, scalar_prefetch = 0 : i64, scratch_operands = 1 : i64, tpu.core_type = #tpu.core_type<tc>, window_params = [{transform_indices = @transform_0, window_bounds = array<i64: 16, 32>}, {transform_indices = @transform_1, window_bounds = array<i64: 32, 96>}, {transform_indices = @transform_2, window_bounds = array<i64: 1, 96>}, {transform_indices = @transform_3, window_bounds = array<i64: 1, 1>}, {transform_indices = @transform_4, window_bounds = array<i64: 1, 1>}, {transform_indices = @transform_5, window_bounds = array<i64: 16, 96>}]} {
    %c0_i32 = arith.constant 0 : i32
    %0 = arith.cmpi eq, %arg1, %c0_i32 : i32
    %1 = arith.extui %0 : i1 to i32
    %c0_i32_0 = arith.constant 0 : i32
    %2 = arith.cmpi ne, %1, %c0_i32_0 : i32
    scf.if %2 {
      %c0_8 = arith.constant 0 : index
      %c0_9 = arith.constant 0 : index
      %10 = vector.load %arg2[%c0_8, %c0_9] : memref<16x32xf32, #tpu.memory_space<vmem>>, vector<16x32xf32>
      %c0_10 = arith.constant 0 : index
      %c0_11 = arith.constant 0 : index
      %11 = memref.load %arg5[%c0_10, %c0_11] : memref<1x1xf32, #tpu.memory_space<smem>>
      %c0_12 = arith.constant 0 : index
      %c0_13 = arith.constant 0 : index
      %12 = memref.load %arg6[%c0_12, %c0_13] : memref<1x1xf32, #tpu.memory_space<smem>>
      %cst_14 = arith.constant dense<0.000000e+00> : vector<16xf32>
      %13 = vector.multi_reduction <add>, %10, %cst_14 [1] : vector<16x32xf32> to vector<16xf32>
      %14 = vector.shape_cast %13 : vector<16xf32> to vector<16x1xf32>
      %cst_15 = arith.constant 3.200000e+01 : f32
      %15 = vector.broadcast %cst_15 : f32 to vector<16x1xf32>
      %16 = arith.divf %14, %15 : vector<16x1xf32>
      %17 = vector.broadcast %16 : vector<16x1xf32> to vector<16x32xf32>
      %18 = arith.subf %10, %17 : vector<16x32xf32>
      %19 = arith.mulf %18, %18 : vector<16x32xf32>
      %cst_16 = arith.constant dense<0.000000e+00> : vector<16xf32>
      %20 = vector.multi_reduction <add>, %19, %cst_16 [1] : vector<16x32xf32> to vector<16xf32>
      %21 = vector.shape_cast %20 : vector<16xf32> to vector<16x1xf32>
      %cst_17 = arith.constant 3.100000e+01 : f32
      %22 = vector.broadcast %cst_17 : f32 to vector<16x1xf32>
      %23 = arith.divf %21, %22 : vector<16x1xf32>
      %24 = math.sqrt %23 : vector<16x1xf32>
      %25 = vector.broadcast %11 : f32 to vector<16x32xf32>
      %26 = arith.mulf %25, %18 : vector<16x32xf32>
      %cst_18 = arith.constant 9.99999997E-7 : f32
      %27 = vector.broadcast %cst_18 : f32 to vector<16x1xf32>
      %28 = arith.addf %24, %27 : vector<16x1xf32>
      %29 = vector.broadcast %28 : vector<16x1xf32> to vector<16x32xf32>
      %30 = arith.divf %26, %29 : vector<16x32xf32>
      %31 = vector.broadcast %12 : f32 to vector<16x32xf32>
      %32 = arith.addf %30, %31 : vector<16x32xf32>
      %33 = arith.truncf %32 : vector<16x32xf32> to vector<16x32xbf16>
      %c0_19 = arith.constant 0 : index
      %c0_20 = arith.constant 0 : index
      %34 = vector.load %arg8[%c0_19, %c0_20] : memref<16x32xbf16, #tpu.memory_space<vmem>>, vector<16x32xbf16>
      tpu.vector_store %arg8[%c0_19, %c0_20], %33 {strides = array<i32>} : memref<16x32xbf16, #tpu.memory_space<vmem>>, vector<16x32xbf16>,
    } else {
    }
    %c0 = arith.constant 0 : index
    %c0_1 = arith.constant 0 : index
    %3 = vector.load %arg8[%c0, %c0_1] : memref<16x32xbf16, #tpu.memory_space<vmem>>, vector<16x32xbf16>
    %c0_2 = arith.constant 0 : index
    %c0_3 = arith.constant 0 : index
    %4 = vector.load %arg3[%c0_2, %c0_3] : memref<32x96xbf16, #tpu.memory_space<vmem>>, vector<32x96xbf16>
    %cst = arith.constant dense<0.000000e+00> : vector<16x96xf32>
    %5 = tpu.matmul %3, %4, %cst {dimension_numbers = #tpu.dot_dimension_numbers<[1], [0], [0], [1], [0, 0, 1, 1], [], []>} : vector<16x32xbf16>, vector<32x96xbf16>, vector<16x96xf32> -> vector<16x96xf32>
    %c0_4 = arith.constant 0 : index
    %c0_5 = arith.constant 0 : index
    %6 = vector.load %arg4[%c0_4, %c0_5] : memref<1x96xf32, #tpu.memory_space<vmem>>, vector<1x96xf32>
    %7 = vector.broadcast %6 : vector<1x96xf32> to vector<16x96xf32>
    %8 = arith.addf %5, %7 : vector<16x96xf32>
    %c0_6 = arith.constant 0 : index
    %c0_7 = arith.constant 0 : index
    %9 = vector.load %arg7[%c0_6, %c0_7] : memref<16x96xf32, #tpu.memory_space<vmem>>, vector<16x96xf32>
    tpu.vector_store %arg7[%c0_6, %c0_7], %8 {strides = array<i32>} : memref<16x96xf32, #tpu.memory_space<vmem>>, vector<16x96xf32>,
    return
  }
  func.func @transform_0(%arg0: i32, %arg1: i32) -> (i32, i32) {
    %c0_i32 = arith.constant 0 : i32
    %c0_i32_0 = arith.constant 0 : i32
    return %arg0, %c0_i32 : i32, i32
  }
  func.func @transform_1(%arg0: i32, %arg1: i32) -> (i32, i32) {
    %c0_i32 = arith.constant 0 : i32
    %c0_i32_0 = arith.constant 0 : i32
    return %c0_i32, %arg1 : i32, i32
  }
  func.func @transform_2(%arg0: i32, %arg1: i32) -> (i32, i32) {
    %c0_i32 = arith.constant 0 : i32
    %c0_i32_0 = arith.constant 0 : i32
    return %c0_i32, %arg1 : i32, i32
  }
  func.func @transform_3(%arg0: i32, %arg1: i32) -> (i32, i32) {
    %c0_i32 = arith.constant 0 : i32
    %c0_i32_0 = arith.constant 0 : i32
    %c0_i32_1 = arith.constant 0 : i32
    return %c0_i32, %c0_i32_0 : i32, i32
  }
  func.func @transform_4(%arg0: i32, %arg1: i32) -> (i32, i32) {
    %c0_i32 = arith.constant 0 : i32
    %c0_i32_0 = arith.constant 0 : i32
    %c0_i32_1 = arith.constant 0 : i32
    return %c0_i32, %c0_i32_0 : i32, i32
  }
  func.func @transform_5(%arg0: i32, %arg1: i32) -> (i32, i32) {
    %c0_i32 = arith.constant 0 : i32
    return %arg0, %arg1 : i32, i32
  }
}

module attributes {stable_mosaic.version = 11 : i64} {
  func.func @_matmul_kernel(%arg0: i32, %arg1: i32, %arg2: i32, %arg3: memref<16x32xf32, #tpu.memory_space<vmem>>, %arg4: memref<32x32xbf16, #tpu.memory_space<vmem>>, %arg5: memref<1x32xf32, #tpu.memory_space<vmem>>, %arg6: memref<16x32xf32, #tpu.memory_space<vmem>>, %arg7: memref<16x32xf32, #tpu.memory_space<vmem>>, %arg8: memref<16x32xf32, #tpu.memory_space<vmem>>) attributes {dimension_semantics = [#tpu.dimension_semantics<parallel>, #tpu.dimension_semantics<parallel>, #tpu.dimension_semantics<arbitrary>], iteration_bounds = array<i64: 1, 1, 1>, scalar_prefetch = 0 : i64, scratch_operands = 1 : i64, tpu.core_type = #tpu.core_type<tc>, window_params = [{transform_indices = @transform_0, window_bounds = array<i64: 16, 32>}, {transform_indices = @transform_1, window_bounds = array<i64: 32, 32>}, {transform_indices = @transform_2, window_bounds = array<i64: 1, 32>}, {transform_indices = @transform_3, window_bounds = array<i64: 16, 32>}, {transform_indices = @transform_4, window_bounds = array<i64: 16, 32>}]} {
    %c0_i32 = arith.constant 0 : i32
    %0 = arith.cmpi eq, %arg2, %c0_i32 : i32
    %1 = arith.extui %0 : i1 to i32
    %c0_i32_0 = arith.constant 0 : i32
    %2 = arith.cmpi ne, %1, %c0_i32_0 : i32
    scf.if %2 {
      %cst_10 = arith.constant 0.000000e+00 : f32
      %13 = vector.broadcast %cst_10 : f32 to vector<16x32xf32>
      %c0_11 = arith.constant 0 : index
      %c0_12 = arith.constant 0 : index
      %14 = vector.load %arg8[%c0_11, %c0_12] : memref<16x32xf32, #tpu.memory_space<vmem>>, vector<16x32xf32>
      tpu.vector_store %arg8[%c0_11, %c0_12], %13 {strides = array<i32>} : memref<16x32xf32, #tpu.memory_space<vmem>>, vector<16x32xf32>,
    } else {
    }
    %c0 = arith.constant 0 : index
    %c0_1 = arith.constant 0 : index
    %3 = vector.load %arg8[%c0, %c0_1] : memref<16x32xf32, #tpu.memory_space<vmem>>, vector<16x32xf32>
    %c0_2 = arith.constant 0 : index
    %c0_3 = arith.constant 0 : index
    %4 = vector.load %arg3[%c0_2, %c0_3] : memref<16x32xf32, #tpu.memory_space<vmem>>, vector<16x32xf32>
    %5 = arith.truncf %4 : vector<16x32xf32> to vector<16x32xbf16>
    %c0_4 = arith.constant 0 : index
    %c0_5 = arith.constant 0 : index
    %6 = vector.load %arg4[%c0_4, %c0_5] : memref<32x32xbf16, #tpu.memory_space<vmem>>, vector<32x32xbf16>
    %cst = arith.constant dense<0.000000e+00> : vector<16x32xf32>
    %7 = tpu.matmul %5, %6, %cst {dimension_numbers = #tpu.dot_dimension_numbers<[1], [0], [0], [1], [0, 0, 1, 1], [], []>} : vector<16x32xbf16>, vector<32x32xbf16>, vector<16x32xf32> -> vector<16x32xf32>
    %8 = arith.addf %3, %7 : vector<16x32xf32>
    %c0_6 = arith.constant 0 : index
    %c0_7 = arith.constant 0 : index
    %9 = vector.load %arg8[%c0_6, %c0_7] : memref<16x32xf32, #tpu.memory_space<vmem>>, vector<16x32xf32>
    tpu.vector_store %arg8[%c0_6, %c0_7], %8 {strides = array<i32>} : memref<16x32xf32, #tpu.memory_space<vmem>>, vector<16x32xf32>,
    %c0_i32_8 = arith.constant 0 : i32
    %10 = arith.cmpi eq, %arg2, %c0_i32_8 : i32
    %11 = arith.extui %10 : i1 to i32
    %c0_i32_9 = arith.constant 0 : i32
    %12 = arith.cmpi ne, %11, %c0_i32_9 : i32
    scf.if %12 {
      %c0_10 = arith.constant 0 : index
      %c0_11 = arith.constant 0 : index
      %13 = vector.load %arg8[%c0_10, %c0_11] : memref<16x32xf32, #tpu.memory_space<vmem>>, vector<16x32xf32>
      %c0_12 = arith.constant 0 : index
      %c0_13 = arith.constant 0 : index
      %14 = vector.load %arg5[%c0_12, %c0_13] : memref<1x32xf32, #tpu.memory_space<vmem>>, vector<1x32xf32>
      %15 = vector.broadcast %14 : vector<1x32xf32> to vector<16x32xf32>
      %16 = arith.addf %13, %15 : vector<16x32xf32>
      %c0_14 = arith.constant 0 : index
      %c0_15 = arith.constant 0 : index
      %17 = vector.load %arg6[%c0_14, %c0_15] : memref<16x32xf32, #tpu.memory_space<vmem>>, vector<16x32xf32>
      %18 = arith.addf %16, %17 : vector<16x32xf32>
      %c0_16 = arith.constant 0 : index
      %c0_17 = arith.constant 0 : index
      %19 = vector.load %arg7[%c0_16, %c0_17] : memref<16x32xf32, #tpu.memory_space<vmem>>, vector<16x32xf32>
      tpu.vector_store %arg7[%c0_16, %c0_17], %18 {strides = array<i32>} : memref<16x32xf32, #tpu.memory_space<vmem>>, vector<16x32xf32>,
    } else {
    }
    return
  }
  func.func @transform_0(%arg0: i32, %arg1: i32, %arg2: i32) -> (i32, i32) {
    %c0_i32 = arith.constant 0 : i32
    return %arg0, %arg2 : i32, i32
  }
  func.func @transform_1(%arg0: i32, %arg1: i32, %arg2: i32) -> (i32, i32) {
    %c0_i32 = arith.constant 0 : i32
    return %arg2, %arg1 : i32, i32
  }
  func.func @transform_2(%arg0: i32, %arg1: i32, %arg2: i32) -> (i32, i32) {
    %c0_i32 = arith.constant 0 : i32
    %c0_i32_0 = arith.constant 0 : i32
    return %c0_i32, %arg1 : i32, i32
  }
  func.func @transform_3(%arg0: i32, %arg1: i32, %arg2: i32) -> (i32, i32) {
    %c0_i32 = arith.constant 0 : i32
    return %arg0, %arg1 : i32, i32
  }
  func.func @transform_4(%arg0: i32, %arg1: i32, %arg2: i32) -> (i32, i32) {
    %c0_i32 = arith.constant 0 : i32
    return %arg0, %arg1 : i32, i32
  }
}

module attributes {stable_mosaic.version = 11 : i64} {
  func.func @_flash_attn_kernel(%arg0: i32, %arg1: i32, %arg2: i32, %arg3: memref<1x8x8xf32, #tpu.memory_space<vmem>>, %arg4: memref<1x4x8x8xf32, #tpu.memory_space<vmem>>, %arg5: memref<1x4x8x8xf32, #tpu.memory_space<vmem>>, %arg6: memref<1x4x8x8xf32, #tpu.memory_space<vmem>>, %arg7: memref<1x4x8x8xf32, #tpu.memory_space<vmem>>, %arg8: memref<4x8x1xf32, #tpu.memory_space<vmem>>, %arg9: memref<4x8x1xf32, #tpu.memory_space<vmem>>, %arg10: memref<4x8x8xf32, #tpu.memory_space<vmem>>) attributes {dimension_semantics = [#tpu.dimension_semantics<parallel>, #tpu.dimension_semantics<parallel>, #tpu.dimension_semantics<arbitrary>], iteration_bounds = array<i64: 2, 1, 1>, scalar_prefetch = 0 : i64, scratch_operands = 3 : i64, tpu.core_type = #tpu.core_type<tc>, window_params = [{transform_indices = @transform_0, window_bounds = array<i64: 1, 8, 8>}, {transform_indices = @transform_1, window_bounds = array<i64: 1, 4, 8, 8>}, {transform_indices = @transform_2, window_bounds = array<i64: 1, 4, 8, 8>}, {transform_indices = @transform_3, window_bounds = array<i64: 1, 4, 8, 8>}, {transform_indices = @transform_4, window_bounds = array<i64: 1, 4, 8, 8>}]} {
    %c0_i32 = arith.constant 0 : i32
    %0 = arith.cmpi eq, %arg2, %c0_i32 : i32
    %1 = arith.extui %0 : i1 to i32
    %c0_i32_0 = arith.constant 0 : i32
    %2 = arith.cmpi ne, %1, %c0_i32_0 : i32
    scf.if %2 {
      %cst_44 = arith.constant 0xFF800000 : f32
      %49 = vector.broadcast %cst_44 : f32 to vector<4x8x1xf32>
      %c0_45 = arith.constant 0 : index
      %c0_46 = arith.constant 0 : index
      %c0_47 = arith.constant 0 : index
      %50 = vector.load %arg8[%c0_45, %c0_46, %c0_47] : memref<4x8x1xf32, #tpu.memory_space<vmem>>, vector<4x8x1xf32>
      tpu.vector_store %arg8[%c0_45, %c0_46, %c0_47], %49 {strides = array<i32>} : memref<4x8x1xf32, #tpu.memory_space<vmem>>, vector<4x8x1xf32>,
      %cst_48 = arith.constant 0.000000e+00 : f32
      %51 = vector.broadcast %cst_48 : f32 to vector<4x8x1xf32>
      %c0_49 = arith.constant 0 : index
      %c0_50 = arith.constant 0 : index
      %c0_51 = arith.constant 0 : index
      %52 = vector.load %arg9[%c0_49, %c0_50, %c0_51] : memref<4x8x1xf32, #tpu.memory_space<vmem>>, vector<4x8x1xf32>
      tpu.vector_store %arg9[%c0_49, %c0_50, %c0_51], %51 {strides = array<i32>} : memref<4x8x1xf32, #tpu.memory_space<vmem>>, vector<4x8x1xf32>,
      %cst_52 = arith.constant 0.000000e+00 : f32
      %53 = vector.broadcast %cst_52 : f32 to vector<4x8x8xf32>
      %c0_53 = arith.constant 0 : index
      %c0_54 = arith.constant 0 : index
      %c0_55 = arith.constant 0 : index
      %54 = vector.load %arg10[%c0_53, %c0_54, %c0_55] : memref<4x8x8xf32, #tpu.memory_space<vmem>>, vector<4x8x8xf32>
      tpu.vector_store %arg10[%c0_53, %c0_54, %c0_55], %53 {strides = array<i32>} : memref<4x8x8xf32, #tpu.memory_space<vmem>>, vector<4x8x8xf32>,
    } else {
    }
    %c0 = arith.constant 0 : index
    %c0_1 = arith.constant 0 : index
    %c0_2 = arith.constant 0 : index
    %c0_3 = arith.constant 0 : index
    %3 = vector.load %arg4[%c0, %c0_1, %c0_2, %c0_3] : memref<1x4x8x8xf32, #tpu.memory_space<vmem>>, vector<1x4x8x8xf32>
    %4 = vector.shape_cast %3 : vector<1x4x8x8xf32> to vector<4x8x8xf32>
    %cst = arith.constant 0.353553385 : f32
    %5 = vector.broadcast %cst : f32 to vector<4x8x8xf32>
    %6 = arith.mulf %4, %5 : vector<4x8x8xf32>
    %7 = arith.truncf %6 : vector<4x8x8xf32> to vector<4x8x8xbf16>
    %c0_4 = arith.constant 0 : index
    %c0_5 = arith.constant 0 : index
    %c0_6 = arith.constant 0 : index
    %c0_7 = arith.constant 0 : index
    %8 = vector.load %arg5[%c0_4, %c0_5, %c0_6, %c0_7] : memref<1x4x8x8xf32, #tpu.memory_space<vmem>>, vector<1x4x8x8xf32>
    %9 = vector.shape_cast %8 : vector<1x4x8x8xf32> to vector<4x8x8xf32>
    %10 = arith.truncf %9 : vector<4x8x8xf32> to vector<4x8x8xbf16>
    %c0_8 = arith.constant 0 : index
    %c0_9 = arith.constant 0 : index
    %c0_10 = arith.constant 0 : index
    %c0_11 = arith.constant 0 : index
    %11 = vector.load %arg6[%c0_8, %c0_9, %c0_10, %c0_11] : memref<1x4x8x8xf32, #tpu.memory_space<vmem>>, vector<1x4x8x8xf32>
    %12 = vector.shape_cast %11 : vector<1x4x8x8xf32> to vector<4x8x8xf32>
    %13 = arith.truncf %12 : vector<4x8x8xf32> to vector<4x8x8xbf16>
    "tpu.trace_start"() <{level = 10 : i32, message = "hqd,hkd->hqk"}> : () -> ()
    %cst_12 = arith.constant dense<0.000000e+00> : vector<4x8x8xf32>
    %14 = tpu.matmul %7, %10, %cst_12 {dimension_numbers = #tpu.dot_dimension_numbers<[2], [2], [1], [1], [0, 0, 0, 1, 1, 1], [0], [0]>} : vector<4x8x8xbf16>, vector<4x8x8xbf16>, vector<4x8x8xf32> -> vector<4x8x8xf32>
    "tpu.trace_stop"() : () -> ()
    %c0_13 = arith.constant 0 : index
    %c0_14 = arith.constant 0 : index
    %c0_15 = arith.constant 0 : index
    %15 = vector.load %arg3[%c0_13, %c0_14, %c0_15] : memref<1x8x8xf32, #tpu.memory_space<vmem>>, vector<1x8x8xf32>
    %cst_16 = arith.constant 0.000000e+00 : f32
    %16 = vector.broadcast %cst_16 : f32 to vector<1x8x8xf32>
    %17 = arith.cmpf oeq, %15, %16 : vector<1x8x8xf32>
    %cst_17 = arith.constant -1.000000e+09 : f32
    %18 = vector.shape_cast %17 : vector<1x8x8xi1> to vector<1x8x8xi1>
    %19 = vector.broadcast %18 : vector<1x8x8xi1> to vector<4x8x8xi1>
    %20 = vector.broadcast %cst_17 : f32 to vector<4x8x8xf32>
    %21 = arith.select %19, %20, %14 : vector<4x8x8xi1>, vector<4x8x8xf32>
    %c0_18 = arith.constant 0 : index
    %c0_19 = arith.constant 0 : index
    %c0_20 = arith.constant 0 : index
    %22 = vector.load %arg8[%c0_18, %c0_19, %c0_20] : memref<4x8x1xf32, #tpu.memory_space<vmem>>, vector<4x8x1xf32>
    %cst_21 = arith.constant dense<0xFF800000> : vector<4x8xf32>
    %23 = vector.multi_reduction <maximumf>, %21, %cst_21 [2] : vector<4x8x8xf32> to vector<4x8xf32>
    %24 = vector.shape_cast %23 : vector<4x8xf32> to vector<4x8x1xf32>
    %25 = arith.maximumf %22, %24 : vector<4x8x1xf32>
    %c0_22 = arith.constant 0 : index
    %c0_23 = arith.constant 0 : index
    %c0_24 = arith.constant 0 : index
    %26 = vector.load %arg8[%c0_22, %c0_23, %c0_24] : memref<4x8x1xf32, #tpu.memory_space<vmem>>, vector<4x8x1xf32>
    %27 = arith.subf %26, %25 : vector<4x8x1xf32>
    %28 = math.exp %27 : vector<4x8x1xf32>
    %29 = vector.broadcast %25 : vector<4x8x1xf32> to vector<4x8x8xf32>
    %30 = arith.subf %21, %29 : vector<4x8x8xf32>
    %31 = math.exp %30 : vector<4x8x8xf32>
    %c0_25 = arith.constant 0 : index
    %c0_26 = arith.constant 0 : index
    %c0_27 = arith.constant 0 : index
    %32 = vector.load %arg9[%c0_25, %c0_26, %c0_27] : memref<4x8x1xf32, #tpu.memory_space<vmem>>, vector<4x8x1xf32>
    %33 = arith.mulf %28, %32 : vector<4x8x1xf32>
    %cst_28 = arith.constant dense<0.000000e+00> : vector<4x8xf32>
    %34 = vector.multi_reduction <add>, %31, %cst_28 [2] : vector<4x8x8xf32> to vector<4x8xf32>
    %35 = vector.shape_cast %34 : vector<4x8xf32> to vector<4x8x1xf32>
    %36 = arith.addf %33, %35 : vector<4x8x1xf32>
    %c0_29 = arith.constant 0 : index
    %c0_30 = arith.constant 0 : index
    %c0_31 = arith.constant 0 : index
    %37 = vector.load %arg9[%c0_29, %c0_30, %c0_31] : memref<4x8x1xf32, #tpu.memory_space<vmem>>, vector<4x8x1xf32>
    tpu.vector_store %arg9[%c0_29, %c0_30, %c0_31], %36 {strides = array<i32>} : memref<4x8x1xf32, #tpu.memory_space<vmem>>, vector<4x8x1xf32>,
    %c0_32 = arith.constant 0 : index
    %c0_33 = arith.constant 0 : index
    %c0_34 = arith.constant 0 : index
    %38 = vector.load %arg10[%c0_32, %c0_33, %c0_34] : memref<4x8x8xf32, #tpu.memory_space<vmem>>, vector<4x8x8xf32>
    %39 = vector.broadcast %28 : vector<4x8x1xf32> to vector<4x8x8xf32>
    %40 = arith.mulf %39, %38 : vector<4x8x8xf32>
    %41 = arith.truncf %31 : vector<4x8x8xf32> to vector<4x8x8xbf16>
    "tpu.trace_start"() <{level = 10 : i32, message = "hqk,hkd->hqd"}> : () -> ()
    %cst_35 = arith.constant dense<0.000000e+00> : vector<4x8x8xf32>
    %42 = tpu.matmul %41, %13, %cst_35 {dimension_numbers = #tpu.dot_dimension_numbers<[2], [1], [1], [2], [0, 0, 0, 1, 1, 2], [0], [0]>} : vector<4x8x8xbf16>, vector<4x8x8xbf16>, vector<4x8x8xf32> -> vector<4x8x8xf32>
    "tpu.trace_stop"() : () -> ()
    %43 = arith.addf %40, %42 : vector<4x8x8xf32>
    %c0_36 = arith.constant 0 : index
    %c0_37 = arith.constant 0 : index
    %c0_38 = arith.constant 0 : index
    %44 = vector.load %arg10[%c0_36, %c0_37, %c0_38] : memref<4x8x8xf32, #tpu.memory_space<vmem>>, vector<4x8x8xf32>
    tpu.vector_store %arg10[%c0_36, %c0_37, %c0_38], %43 {strides = array<i32>} : memref<4x8x8xf32, #tpu.memory_space<vmem>>, vector<4x8x8xf32>,
    %c0_39 = arith.constant 0 : index
    %c0_40 = arith.constant 0 : index
    %c0_41 = arith.constant 0 : index
    %45 = vector.load %arg8[%c0_39, %c0_40, %c0_41] : memref<4x8x1xf32, #tpu.memory_space<vmem>>, vector<4x8x1xf32>
    tpu.vector_store %arg8[%c0_39, %c0_40, %c0_41], %25 {strides = array<i32>} : memref<4x8x1xf32, #tpu.memory_space<vmem>>, vector<4x8x1xf32>,
    %c0_i32_42 = arith.constant 0 : i32
    %46 = arith.cmpi eq, %arg2, %c0_i32_42 : i32
    %47 = arith.extui %46 : i1 to i32
    %c0_i32_43 = arith.constant 0 : i32
    %48 = arith.cmpi ne, %47, %c0_i32_43 : i32
    scf.if %48 {
      %c0_44 = arith.constant 0 : index
      %c0_45 = arith.constant 0 : index
      %c0_46 = arith.constant 0 : index
      %49 = vector.load %arg10[%c0_44, %c0_45, %c0_46] : memref<4x8x8xf32, #tpu.memory_space<vmem>>, vector<4x8x8xf32>
      %c0_47 = arith.constant 0 : index
      %c0_48 = arith.constant 0 : index
      %c0_49 = arith.constant 0 : index
      %50 = vector.load %arg9[%c0_47, %c0_48, %c0_49] : memref<4x8x1xf32, #tpu.memory_space<vmem>>, vector<4x8x1xf32>
      %51 = tpu.reciprocal %50 {approx = true} : vector<4x8x1xf32> -> vector<4x8x1xf32>
      %52 = vector.broadcast %51 : vector<4x8x1xf32> to vector<4x8x8xf32>
      %53 = arith.mulf %49, %52 : vector<4x8x8xf32>
      %c0_50 = arith.constant 0 : index
      %c0_51 = arith.constant 0 : index
      %c0_52 = arith.constant 0 : index
      %c0_53 = arith.constant 0 : index
      %54 = vector.load %arg7[%c0_50, %c0_51, %c0_52, %c0_53] : memref<1x4x8x8xf32, #tpu.memory_space<vmem>>, vector<1x4x8x8xf32>
      %55 = vector.shape_cast %54 : vector<1x4x8x8xf32> to vector<4x8x8xf32>
      %56 = vector.shape_cast %53 : vector<4x8x8xf32> to vector<1x4x8x8xf32>
      tpu.vector_store %arg7[%c0_50, %c0_51, %c0_52, %c0_53], %56 {strides = array<i32>} : memref<1x4x8x8xf32, #tpu.memory_space<vmem>>, vector<1x4x8x8xf32>,
    } else {
    }
    return
  }
  func.func @transform_0(%arg0: i32, %arg1: i32, %arg2: i32) -> (i32, i32, i32) {
    %c0_i32 = arith.constant 0 : i32
    %c0_i32_0 = arith.constant 0 : i32
    return %c0_i32, %arg1, %arg2 : i32, i32, i32
  }
  func.func @transform_1(%arg0: i32, %arg1: i32, %arg2: i32) -> (i32, i32, i32, i32) {
    %c0_i32 = arith.constant 0 : i32
    %c0_i32_0 = arith.constant 0 : i32
    %c0_i32_1 = arith.constant 0 : i32
    return %arg0, %c0_i32, %arg1, %c0_i32_0 : i32, i32, i32, i32
  }
  func.func @transform_2(%arg0: i32, %arg1: i32, %arg2: i32) -> (i32, i32, i32, i32) {
    %c0_i32 = arith.constant 0 : i32
    %c0_i32_0 = arith.constant 0 : i32
    %c0_i32_1 = arith.constant 0 : i32
    return %arg0, %c0_i32, %arg2, %c0_i32_0 : i32, i32, i32, i32
  }
  func.func @transform_3(%arg0: i32, %arg1: i32, %arg2: i32) -> (i32, i32, i32, i32) {
    %c0_i32 = arith.constant 0 : i32
    %c0_i32_0 = arith.constant 0 : i32
    %c0_i32_1 = arith.constant 0 : i32
    return %arg0, %c0_i32, %arg2, %c0_i32_0 : i32, i32, i32, i32
  }
  func.func @transform_4(%arg0: i32, %arg1: i32, %arg2: i32) -> (i32, i32, i32, i32) {
    %c0_i32 = arith.constant 0 : i32
    %c0_i32_0 = arith.constant 0 : i32
    %c0_i32_1 = arith.constant 0 : i32
    return %arg0, %c0_i32, %arg1, %c0_i32_0 : i32, i32, i32, i32
  }
}

module attributes {stable_mosaic.version = 11 : i64} {
  func.func @_ln_matmul_kernel(%arg0: i32, %arg1: i32, %arg2: memref<16x32xf32, #tpu.memory_space<vmem>>, %arg3: memref<32x32xbf16, #tpu.memory_space<vmem>>, %arg4: memref<1x32xf32, #tpu.memory_space<vmem>>, %arg5: memref<1x1xf32, #tpu.memory_space<smem>>, %arg6: memref<1x1xf32, #tpu.memory_space<smem>>, %arg7: memref<16x32xf32, #tpu.memory_space<vmem>>, %arg8: memref<16x32xbf16, #tpu.memory_space<vmem>>) attributes {dimension_semantics = [#tpu.dimension_semantics<parallel>, #tpu.dimension_semantics<arbitrary>], iteration_bounds = array<i64: 1, 1>, scalar_prefetch = 0 : i64, scratch_operands = 1 : i64, tpu.core_type = #tpu.core_type<tc>, window_params = [{transform_indices = @transform_0, window_bounds = array<i64: 16, 32>}, {transform_indices = @transform_1, window_bounds = array<i64: 32, 32>}, {transform_indices = @transform_2, window_bounds = array<i64: 1, 32>}, {transform_indices = @transform_3, window_bounds = array<i64: 1, 1>}, {transform_indices = @transform_4, window_bounds = array<i64: 1, 1>}, {transform_indices = @transform_5, window_bounds = array<i64: 16, 32>}]} {
    %c0_i32 = arith.constant 0 : i32
    %0 = arith.cmpi eq, %arg1, %c0_i32 : i32
    %1 = arith.extui %0 : i1 to i32
    %c0_i32_0 = arith.constant 0 : i32
    %2 = arith.cmpi ne, %1, %c0_i32_0 : i32
    scf.if %2 {
      %c0_8 = arith.constant 0 : index
      %c0_9 = arith.constant 0 : index
      %10 = vector.load %arg2[%c0_8, %c0_9] : memref<16x32xf32, #tpu.memory_space<vmem>>, vector<16x32xf32>
      %c0_10 = arith.constant 0 : index
      %c0_11 = arith.constant 0 : index
      %11 = memref.load %arg5[%c0_10, %c0_11] : memref<1x1xf32, #tpu.memory_space<smem>>
      %c0_12 = arith.constant 0 : index
      %c0_13 = arith.constant 0 : index
      %12 = memref.load %arg6[%c0_12, %c0_13] : memref<1x1xf32, #tpu.memory_space<smem>>
      %cst_14 = arith.constant dense<0.000000e+00> : vector<16xf32>
      %13 = vector.multi_reduction <add>, %10, %cst_14 [1] : vector<16x32xf32> to vector<16xf32>
      %14 = vector.shape_cast %13 : vector<16xf32> to vector<16x1xf32>
      %cst_15 = arith.constant 3.200000e+01 : f32
      %15 = vector.broadcast %cst_15 : f32 to vector<16x1xf32>
      %16 = arith.divf %14, %15 : vector<16x1xf32>
      %17 = vector.broadcast %16 : vector<16x1xf32> to vector<16x32xf32>
      %18 = arith.subf %10, %17 : vector<16x32xf32>
      %19 = arith.mulf %18, %18 : vector<16x32xf32>
      %cst_16 = arith.constant dense<0.000000e+00> : vector<16xf32>
      %20 = vector.multi_reduction <add>, %19, %cst_16 [1] : vector<16x32xf32> to vector<16xf32>
      %21 = vector.shape_cast %20 : vector<16xf32> to vector<16x1xf32>
      %cst_17 = arith.constant 3.100000e+01 : f32
      %22 = vector.broadcast %cst_17 : f32 to vector<16x1xf32>
      %23 = arith.divf %21, %22 : vector<16x1xf32>
      %24 = math.sqrt %23 : vector<16x1xf32>
      %25 = vector.broadcast %11 : f32 to vector<16x32xf32>
      %26 = arith.mulf %25, %18 : vector<16x32xf32>
      %cst_18 = arith.constant 9.99999997E-7 : f32
      %27 = vector.broadcast %cst_18 : f32 to vector<16x1xf32>
      %28 = arith.addf %24, %27 : vector<16x1xf32>
      %29 = vector.broadcast %28 : vector<16x1xf32> to vector<16x32xf32>
      %30 = arith.divf %26, %29 : vector<16x32xf32>
      %31 = vector.broadcast %12 : f32 to vector<16x32xf32>
      %32 = arith.addf %30, %31 : vector<16x32xf32>
      %33 = arith.truncf %32 : vector<16x32xf32> to vector<16x32xbf16>
      %c0_19 = arith.constant 0 : index
      %c0_20 = arith.constant 0 : index
      %34 = vector.load %arg8[%c0_19, %c0_20] : memref<16x32xbf16, #tpu.memory_space<vmem>>, vector<16x32xbf16>
      tpu.vector_store %arg8[%c0_19, %c0_20], %33 {strides = array<i32>} : memref<16x32xbf16, #tpu.memory_space<vmem>>, vector<16x32xbf16>,
    } else {
    }
    %c0 = arith.constant 0 : index
    %c0_1 = arith.constant 0 : index
    %3 = vector.load %arg8[%c0, %c0_1] : memref<16x32xbf16, #tpu.memory_space<vmem>>, vector<16x32xbf16>
    %c0_2 = arith.constant 0 : index
    %c0_3 = arith.constant 0 : index
    %4 = vector.load %arg3[%c0_2, %c0_3] : memref<32x32xbf16, #tpu.memory_space<vmem>>, vector<32x32xbf16>
    %cst = arith.constant dense<0.000000e+00> : vector<16x32xf32>
    %5 = tpu.matmul %3, %4, %cst {dimension_numbers = #tpu.dot_dimension_numbers<[1], [0], [0], [1], [0, 0, 1, 1], [], []>} : vector<16x32xbf16>, vector<32x32xbf16>, vector<16x32xf32> -> vector<16x32xf32>
    %c0_4 = arith.constant 0 : index
    %c0_5 = arith.constant 0 : index
    %6 = vector.load %arg4[%c0_4, %c0_5] : memref<1x32xf32, #tpu.memory_space<vmem>>, vector<1x32xf32>
    %7 = vector.broadcast %6 : vector<1x32xf32> to vector<16x32xf32>
    %8 = arith.addf %5, %7 : vector<16x32xf32>
    %c0_6 = arith.constant 0 : index
    %c0_7 = arith.constant 0 : index
    %9 = vector.load %arg7[%c0_6, %c0_7] : memref<16x32xf32, #tpu.memory_space<vmem>>, vector<16x32xf32>
    tpu.vector_store %arg7[%c0_6, %c0_7], %8 {strides = array<i32>} : memref<16x32xf32, #tpu.memory_space<vmem>>, vector<16x32xf32>,
    return
  }
  func.func @transform_0(%arg0: i32, %arg1: i32) -> (i32, i32) {
    %c0_i32 = arith.constant 0 : i32
    %c0_i32_0 = arith.constant 0 : i32
    return %arg0, %c0_i32 : i32, i32
  }
  func.func @transform_1(%arg0: i32, %arg1: i32) -> (i32, i32) {
    %c0_i32 = arith.constant 0 : i32
    %c0_i32_0 = arith.constant 0 : i32
    return %c0_i32, %arg1 : i32, i32
  }
  func.func @transform_2(%arg0: i32, %arg1: i32) -> (i32, i32) {
    %c0_i32 = arith.constant 0 : i32
    %c0_i32_0 = arith.constant 0 : i32
    return %c0_i32, %arg1 : i32, i32
  }
  func.func @transform_3(%arg0: i32, %arg1: i32) -> (i32, i32) {
    %c0_i32 = arith.constant 0 : i32
    %c0_i32_0 = arith.constant 0 : i32
    %c0_i32_1 = arith.constant 0 : i32
    return %c0_i32, %c0_i32_0 : i32, i32
  }
  func.func @transform_4(%arg0: i32, %arg1: i32) -> (i32, i32) {
    %c0_i32 = arith.constant 0 : i32
    %c0_i32_0 = arith.constant 0 : i32
    %c0_i32_1 = arith.constant 0 : i32
    return %c0_i32, %c0_i32_0 : i32, i32
  }
  func.func @transform_5(%arg0: i32, %arg1: i32) -> (i32, i32) {
    %c0_i32 = arith.constant 0 : i32
    return %arg0, %arg1 : i32, i32
  }
}

module attributes {stable_mosaic.version = 11 : i64} {
  func.func @_matmul_kernel(%arg0: i32, %arg1: i32, %arg2: i32, %arg3: memref<16x32xf32, #tpu.memory_space<vmem>>, %arg4: memref<32x64xbf16, #tpu.memory_space<vmem>>, %arg5: memref<1x64xf32, #tpu.memory_space<vmem>>, %arg6: memref<16x64xf32, #tpu.memory_space<vmem>>, %arg7: memref<16x64xf32, #tpu.memory_space<vmem>>) attributes {dimension_semantics = [#tpu.dimension_semantics<parallel>, #tpu.dimension_semantics<parallel>, #tpu.dimension_semantics<arbitrary>], iteration_bounds = array<i64: 1, 1, 1>, scalar_prefetch = 0 : i64, scratch_operands = 1 : i64, tpu.core_type = #tpu.core_type<tc>, window_params = [{transform_indices = @transform_0, window_bounds = array<i64: 16, 32>}, {transform_indices = @transform_1, window_bounds = array<i64: 32, 64>}, {transform_indices = @transform_2, window_bounds = array<i64: 1, 64>}, {transform_indices = @transform_3, window_bounds = array<i64: 16, 64>}]} {
    %c0_i32 = arith.constant 0 : i32
    %0 = arith.cmpi eq, %arg2, %c0_i32 : i32
    %1 = arith.extui %0 : i1 to i32
    %c0_i32_0 = arith.constant 0 : i32
    %2 = arith.cmpi ne, %1, %c0_i32_0 : i32
    scf.if %2 {
      %cst_10 = arith.constant 0.000000e+00 : f32
      %13 = vector.broadcast %cst_10 : f32 to vector<16x64xf32>
      %c0_11 = arith.constant 0 : index
      %c0_12 = arith.constant 0 : index
      %14 = vector.load %arg7[%c0_11, %c0_12] : memref<16x64xf32, #tpu.memory_space<vmem>>, vector<16x64xf32>
      tpu.vector_store %arg7[%c0_11, %c0_12], %13 {strides = array<i32>} : memref<16x64xf32, #tpu.memory_space<vmem>>, vector<16x64xf32>,
    } else {
    }
    %c0 = arith.constant 0 : index
    %c0_1 = arith.constant 0 : index
    %3 = vector.load %arg7[%c0, %c0_1] : memref<16x64xf32, #tpu.memory_space<vmem>>, vector<16x64xf32>
    %c0_2 = arith.constant 0 : index
    %c0_3 = arith.constant 0 : index
    %4 = vector.load %arg3[%c0_2, %c0_3] : memref<16x32xf32, #tpu.memory_space<vmem>>, vector<16x32xf32>
    %5 = arith.truncf %4 : vector<16x32xf32> to vector<16x32xbf16>
    %c0_4 = arith.constant 0 : index
    %c0_5 = arith.constant 0 : index
    %6 = vector.load %arg4[%c0_4, %c0_5] : memref<32x64xbf16, #tpu.memory_space<vmem>>, vector<32x64xbf16>
    %cst = arith.constant dense<0.000000e+00> : vector<16x64xf32>
    %7 = tpu.matmul %5, %6, %cst {dimension_numbers = #tpu.dot_dimension_numbers<[1], [0], [0], [1], [0, 0, 1, 1], [], []>} : vector<16x32xbf16>, vector<32x64xbf16>, vector<16x64xf32> -> vector<16x64xf32>
    %8 = arith.addf %3, %7 : vector<16x64xf32>
    %c0_6 = arith.constant 0 : index
    %c0_7 = arith.constant 0 : index
    %9 = vector.load %arg7[%c0_6, %c0_7] : memref<16x64xf32, #tpu.memory_space<vmem>>, vector<16x64xf32>
    tpu.vector_store %arg7[%c0_6, %c0_7], %8 {strides = array<i32>} : memref<16x64xf32, #tpu.memory_space<vmem>>, vector<16x64xf32>,
    %c0_i32_8 = arith.constant 0 : i32
    %10 = arith.cmpi eq, %arg2, %c0_i32_8 : i32
    %11 = arith.extui %10 : i1 to i32
    %c0_i32_9 = arith.constant 0 : i32
    %12 = arith.cmpi ne, %11, %c0_i32_9 : i32
    scf.if %12 {
      %c0_10 = arith.constant 0 : index
      %c0_11 = arith.constant 0 : index
      %13 = vector.load %arg7[%c0_10, %c0_11] : memref<16x64xf32, #tpu.memory_space<vmem>>, vector<16x64xf32>
      %c0_12 = arith.constant 0 : index
      %c0_13 = arith.constant 0 : index
      %14 = vector.load %arg5[%c0_12, %c0_13] : memref<1x64xf32, #tpu.memory_space<vmem>>, vector<1x64xf32>
      %15 = vector.broadcast %14 : vector<1x64xf32> to vector<16x64xf32>
      %16 = arith.addf %13, %15 : vector<16x64xf32>
      %c0_14 = arith.constant 0 : index
      %c0_15 = arith.constant 0 : index
      %17 = vector.load %arg6[%c0_14, %c0_15] : memref<16x64xf32, #tpu.memory_space<vmem>>, vector<16x64xf32>
      tpu.vector_store %arg6[%c0_14, %c0_15], %16 {strides = array<i32>} : memref<16x64xf32, #tpu.memory_space<vmem>>, vector<16x64xf32>,
    } else {
    }
    return
  }
  func.func @transform_0(%arg0: i32, %arg1: i32, %arg2: i32) -> (i32, i32) {
    %c0_i32 = arith.constant 0 : i32
    return %arg0, %arg2 : i32, i32
  }
  func.func @transform_1(%arg0: i32, %arg1: i32, %arg2: i32) -> (i32, i32) {
    %c0_i32 = arith.constant 0 : i32
    return %arg2, %arg1 : i32, i32
  }
  func.func @transform_2(%arg0: i32, %arg1: i32, %arg2: i32) -> (i32, i32) {
    %c0_i32 = arith.constant 0 : i32
    %c0_i32_0 = arith.constant 0 : i32
    return %c0_i32, %arg1 : i32, i32
  }
  func.func @transform_3(%arg0: i32, %arg1: i32, %arg2: i32) -> (i32, i32) {
    %c0_i32 = arith.constant 0 : i32
    return %arg0, %arg1 : i32, i32
  }
}

module attributes {stable_mosaic.version = 11 : i64} {
  func.func @_ffn_kernel(%arg0: i32, %arg1: i32, %arg2: memref<16x32xf32, #tpu.memory_space<vmem>>, %arg3: memref<32x64xbf16, #tpu.memory_space<vmem>>, %arg4: memref<1x64xf32, #tpu.memory_space<vmem>>, %arg5: memref<64x32xbf16, #tpu.memory_space<vmem>>, %arg6: memref<1x32xf32, #tpu.memory_space<vmem>>, %arg7: memref<1x1xf32, #tpu.memory_space<smem>>, %arg8: memref<1x1xf32, #tpu.memory_space<smem>>, %arg9: memref<16x32xf32, #tpu.memory_space<vmem>>, %arg10: memref<16x32xbf16, #tpu.memory_space<vmem>>, %arg11: memref<16x32xf32, #tpu.memory_space<vmem>>) attributes {dimension_semantics = [#tpu.dimension_semantics<parallel>, #tpu.dimension_semantics<arbitrary>], iteration_bounds = array<i64: 1, 1>, scalar_prefetch = 0 : i64, scratch_operands = 2 : i64, tpu.core_type = #tpu.core_type<tc>, window_params = [{transform_indices = @transform_0, window_bounds = array<i64: 16, 32>}, {transform_indices = @transform_1, window_bounds = array<i64: 32, 64>}, {transform_indices = @transform_2, window_bounds = array<i64: 1, 64>}, {transform_indices = @transform_3, window_bounds = array<i64: 64, 32>}, {pipeline_mode = #tpu.pipeline_mode<synchronous>, transform_indices = @transform_4, window_bounds = array<i64: 1, 32>}, {transform_indices = @transform_5, window_bounds = array<i64: 1, 1>}, {transform_indices = @transform_6, window_bounds = array<i64: 1, 1>}, {transform_indices = @transform_7, window_bounds = array<i64: 16, 32>}]} {
    %c0_i32 = arith.constant 0 : i32
    %0 = arith.cmpi eq, %arg1, %c0_i32 : i32
    %1 = arith.extui %0 : i1 to i32
    %c0_i32_0 = arith.constant 0 : i32
    %2 = arith.cmpi ne, %1, %c0_i32_0 : i32
    scf.if %2 {
      %c0_16 = arith.constant 0 : index
      %c0_17 = arith.constant 0 : index
      %20 = vector.load %arg2[%c0_16, %c0_17] : memref<16x32xf32, #tpu.memory_space<vmem>>, vector<16x32xf32>
      %c0_18 = arith.constant 0 : index
      %c0_19 = arith.constant 0 : index
      %21 = memref.load %arg7[%c0_18, %c0_19] : memref<1x1xf32, #tpu.memory_space<smem>>
      %c0_20 = arith.constant 0 : index
      %c0_21 = arith.constant 0 : index
      %22 = memref.load %arg8[%c0_20, %c0_21] : memref<1x1xf32, #tpu.memory_space<smem>>
      %cst_22 = arith.constant dense<0.000000e+00> : vector<16xf32>
      %23 = vector.multi_reduction <add>, %20, %cst_22 [1] : vector<16x32xf32> to vector<16xf32>
      %24 = vector.shape_cast %23 : vector<16xf32> to vector<16x1xf32>
      %cst_23 = arith.constant 3.200000e+01 : f32
      %25 = vector.broadcast %cst_23 : f32 to vector<16x1xf32>
      %26 = arith.divf %24, %25 : vector<16x1xf32>
      %27 = vector.broadcast %26 : vector<16x1xf32> to vector<16x32xf32>
      %28 = arith.subf %20, %27 : vector<16x32xf32>
      %29 = arith.mulf %28, %28 : vector<16x32xf32>
      %cst_24 = arith.constant dense<0.000000e+00> : vector<16xf32>
      %30 = vector.multi_reduction <add>, %29, %cst_24 [1] : vector<16x32xf32> to vector<16xf32>
      %31 = vector.shape_cast %30 : vector<16xf32> to vector<16x1xf32>
      %cst_25 = arith.constant 3.100000e+01 : f32
      %32 = vector.broadcast %cst_25 : f32 to vector<16x1xf32>
      %33 = arith.divf %31, %32 : vector<16x1xf32>
      %34 = math.sqrt %33 : vector<16x1xf32>
      %35 = vector.broadcast %21 : f32 to vector<16x32xf32>
      %36 = arith.mulf %35, %28 : vector<16x32xf32>
      %cst_26 = arith.constant 9.99999997E-7 : f32
      %37 = vector.broadcast %cst_26 : f32 to vector<16x1xf32>
      %38 = arith.addf %34, %37 : vector<16x1xf32>
      %39 = vector.broadcast %38 : vector<16x1xf32> to vector<16x32xf32>
      %40 = arith.divf %36, %39 : vector<16x32xf32>
      %41 = vector.broadcast %22 : f32 to vector<16x32xf32>
      %42 = arith.addf %40, %41 : vector<16x32xf32>
      %43 = arith.truncf %42 : vector<16x32xf32> to vector<16x32xbf16>
      %c0_27 = arith.constant 0 : index
      %c0_28 = arith.constant 0 : index
      %44 = vector.load %arg10[%c0_27, %c0_28] : memref<16x32xbf16, #tpu.memory_space<vmem>>, vector<16x32xbf16>
      tpu.vector_store %arg10[%c0_27, %c0_28], %43 {strides = array<i32>} : memref<16x32xbf16, #tpu.memory_space<vmem>>, vector<16x32xbf16>,
      %cst_29 = arith.constant 0.000000e+00 : f32
      %45 = vector.broadcast %cst_29 : f32 to vector<16x32xf32>
      %c0_30 = arith.constant 0 : index
      %c0_31 = arith.constant 0 : index
      %46 = vector.load %arg11[%c0_30, %c0_31] : memref<16x32xf32, #tpu.memory_space<vmem>>, vector<16x32xf32>
      tpu.vector_store %arg11[%c0_30, %c0_31], %45 {strides = array<i32>} : memref<16x32xf32, #tpu.memory_space<vmem>>, vector<16x32xf32>,
    } else {
    }
    %c0 = arith.constant 0 : index
    %c0_1 = arith.constant 0 : index
    %3 = vector.load %arg10[%c0, %c0_1] : memref<16x32xbf16, #tpu.memory_space<vmem>>, vector<16x32xbf16>
    %c0_2 = arith.constant 0 : index
    %c0_3 = arith.constant 0 : index
    %4 = vector.load %arg3[%c0_2, %c0_3] : memref<32x64xbf16, #tpu.memory_space<vmem>>, vector<32x64xbf16>
    %cst = arith.constant dense<0.000000e+00> : vector<16x64xf32>
    %5 = tpu.matmul %3, %4, %cst {dimension_numbers = #tpu.dot_dimension_numbers<[1], [0], [0], [1], [0, 0, 1, 1], [], []>} : vector<16x32xbf16>, vector<32x64xbf16>, vector<16x64xf32> -> vector<16x64xf32>
    %c0_4 = arith.constant 0 : index
    %c0_5 = arith.constant 0 : index
    %6 = vector.load %arg4[%c0_4, %c0_5] : memref<1x64xf32, #tpu.memory_space<vmem>>, vector<1x64xf32>
    %7 = vector.broadcast %6 : vector<1x64xf32> to vector<16x64xf32>
    %8 = arith.addf %5, %7 : vector<16x64xf32>
    %cst_6 = arith.constant 0.000000e+00 : f32
    %9 = vector.broadcast %cst_6 : f32 to vector<16x64xf32>
    %10 = arith.maximumf %8, %9 : vector<16x64xf32>
    %c0_7 = arith.constant 0 : index
    %c0_8 = arith.constant 0 : index
    %11 = vector.load %arg11[%c0_7, %c0_8] : memref<16x32xf32, #tpu.memory_space<vmem>>, vector<16x32xf32>
    %12 = arith.truncf %10 : vector<16x64xf32> to vector<16x64xbf16>
    %c0_9 = arith.constant 0 : index
    %c0_10 = arith.constant 0 : index
    %13 = vector.load %arg5[%c0_9, %c0_10] : memref<64x32xbf16, #tpu.memory_space<vmem>>, vector<64x32xbf16>
    %cst_11 = arith.constant dense<0.000000e+00> : vector<16x32xf32>
    %14 = tpu.matmul %12, %13, %cst_11 {dimension_numbers = #tpu.dot_dimension_numbers<[1], [0], [0], [1], [0, 0, 1, 1], [], []>} : vector<16x64xbf16>, vector<64x32xbf16>, vector<16x32xf32> -> vector<16x32xf32>
    %15 = arith.addf %11, %14 : vector<16x32xf32>
    %c0_12 = arith.constant 0 : index
    %c0_13 = arith.constant 0 : index
    %16 = vector.load %arg11[%c0_12, %c0_13] : memref<16x32xf32, #tpu.memory_space<vmem>>, vector<16x32xf32>
    tpu.vector_store %arg11[%c0_12, %c0_13], %15 {strides = array<i32>} : memref<16x32xf32, #tpu.memory_space<vmem>>, vector<16x32xf32>,
    %c0_i32_14 = arith.constant 0 : i32
    %17 = arith.cmpi eq, %arg1, %c0_i32_14 : i32
    %18 = arith.extui %17 : i1 to i32
    %c0_i32_15 = arith.constant 0 : i32
    %19 = arith.cmpi ne, %18, %c0_i32_15 : i32
    scf.if %19 {
      %c0_16 = arith.constant 0 : index
      %c0_17 = arith.constant 0 : index
      %20 = vector.load %arg11[%c0_16, %c0_17] : memref<16x32xf32, #tpu.memory_space<vmem>>, vector<16x32xf32>
      %c0_18 = arith.constant 0 : index
      %c0_19 = arith.constant 0 : index
      %21 = vector.load %arg6[%c0_18, %c0_19] : memref<1x32xf32, #tpu.memory_space<vmem>>, vector<1x32xf32>
      %22 = vector.broadcast %21 : vector<1x32xf32> to vector<16x32xf32>
      %23 = arith.addf %20, %22 : vector<16x32xf32>
      %c0_20 = arith.constant 0 : index
      %c0_21 = arith.constant 0 : index
      %24 = vector.load %arg2[%c0_20, %c0_21] : memref<16x32xf32, #tpu.memory_space<vmem>>, vector<16x32xf32>
      %25 = arith.addf %23, %24 : vector<16x32xf32>
      %c0_22 = arith.constant 0 : index
      %c0_23 = arith.constant 0 : index
      %26 = vector.load %arg9[%c0_22, %c0_23] : memref<16x32xf32, #tpu.memory_space<vmem>>, vector<16x32xf32>
      tpu.vector_store %arg9[%c0_22, %c0_23], %25 {strides = array<i32>} : memref<16x32xf32, #tpu.memory_space<vmem>>, vector<16x32xf32>,
    } else {
    }
    return
  }
  func.func @transform_0(%arg0: i32, %arg1: i32) -> (i32, i32) {
    %c0_i32 = arith.constant 0 : i32
    %c0_i32_0 = arith.constant 0 : i32
    return %arg0, %c0_i32 : i32, i32
  }
  func.func @transform_1(%arg0: i32, %arg1: i32) -> (i32, i32) {
    %c0_i32 = arith.constant 0 : i32
    %c0_i32_0 = arith.constant 0 : i32
    return %c0_i32, %arg1 : i32, i32
  }
  func.func @transform_2(%arg0: i32, %arg1: i32) -> (i32, i32) {
    %c0_i32 = arith.constant 0 : i32
    %c0_i32_0 = arith.constant 0 : i32
    return %c0_i32, %arg1 : i32, i32
  }
  func.func @transform_3(%arg0: i32, %arg1: i32) -> (i32, i32) {
    %c0_i32 = arith.constant 0 : i32
    %c0_i32_0 = arith.constant 0 : i32
    return %arg1, %c0_i32 : i32, i32
  }
  func.func @transform_4(%arg0: i32, %arg1: i32) -> (i32, i32) {
    %c0_i32 = arith.constant 0 : i32
    %c0_i32_0 = arith.constant 0 : i32
    %c0_i32_1 = arith.constant 0 : i32
    return %c0_i32, %c0_i32_0 : i32, i32
  }
  func.func @transform_5(%arg0: i32, %arg1: i32) -> (i32, i32) {
    %c0_i32 = arith.constant 0 : i32
    %c0_i32_0 = arith.constant 0 : i32
    %c0_i32_1 = arith.constant 0 : i32
    return %c0_i32, %c0_i32_0 : i32, i32
  }
  func.func @transform_6(%arg0: i32, %arg1: i32) -> (i32, i32) {
    %c0_i32 = arith.constant 0 : i32
    %c0_i32_0 = arith.constant 0 : i32
    %c0_i32_1 = arith.constant 0 : i32
    return %c0_i32, %c0_i32_0 : i32, i32
  }
  func.func @transform_7(%arg0: i32, %arg1: i32) -> (i32, i32) {
    %c0_i32 = arith.constant 0 : i32
    %c0_i32_0 = arith.constant 0 : i32
    return %arg0, %c0_i32 : i32, i32
  }
}

</mosaic_0001>

<bundles_post_ra>
// kernel: decoder_block_forward.10
= control target key start
LH: loop header
LB: loop body
LE: loop exit
PB: predicated region body
PF: predicated region fallthrough
CT: control target
= control target key end

     0   :  { %vm22_vm0 = vcmask 261120   ;;  %v138_v0 = vmov 0.0   ;;  %vm139_vm1 = vmmov 0   ;;  %s199_s1 = inlined_call_operand.vmem [shape: bf16[32,32], index: 1, kind: input, shape index: {}]   ;;  %s200_s0 = inlined_call_operand.vmem [shape: f32[16,32], index: 0, kind: input, shape index: {}]   ;;  %s201_s2 = inlined_call_operand.vmem [shape: f32[1,32], index: 2, kind: input, shape index: {}]   ;;  %s202_s3 = inlined_call_operand.vmem [shape: f32[16,32], index: 3, kind: input, shape index: {}]   ;;  %s203_s4 = inlined_call_operand.vmem [shape: f32[16,32], index: 4, kind: output, shape index: {}]  }
   0x1   :  { %126 = vmatprep.subr.bf16.mxu0 %v138_v0  ;;  %v136_v1 = vld [vmem:[%s199_s1] sm:$0xff]   ;;  %130 = vmatprep.mubr.msk.bf16.mxu0 %vm139_vm1, %v138_v0  ;;  %23 = vst.msk [vmem:[#allocation2] sm:$0xff] %vm22_vm0, %v138_v0  ;;  %24 = vst.msk [vmem:[#allocation2 + $0x8] sm:$0xff] %vm22_vm0, %v138_v0  ;;  %v137_v2 = vld [vmem:[%s199_s1 + $0x8] sm:$0xff]  }
   0x2   :  { %127 = vmatpush3.bf16.msra.mxu0 %v136_v1  ;;  %v27_v3 = vld [vmem:[%s200_s0] sm:$0xff]  ;;  %v28_v4 = vld [vmem:[%s200_s0 + $0x8] sm:$0xff] }
   0x3   :  { %128 = vmatprep.subr.bf16.mxu0 %v138_v0  ;;  %v29_v5 = vpack.c.bf16 %v28_v4, %v27_v3  ;;  %v122_v14 = vld [vmem:[%s201_s2] ss:$0 sm:$0xff]  ;;  %v110_v19 = vld [vmem:[%s202_s3 + $0x8] sm:$0xff] }
   0x4   :  { %v109_v16 = vld [vmem:[%s202_s3] sm:$0xff] }
   0x6   :  { %129 = vmatpush3.bf16.msra.mxu0 %v137_v2 }
   0x8   :  { %v25_v6 = vld [vmem:[#allocation2] sm:$0xff]  ;;  %v26_v8 = vld [vmem:[#allocation2 + $0x8] sm:$0xff] }
   0x9   :  { %131 = vmatmul.mubr.msk.bf16.vlgmr.msra.gmra.mrb[0].mxu0 %vm22_vm0, %v29_v5 }
  0xdc   :  { %v84_v7 = vpop.f32.mrb[0].mxu0 }
  0xdd   :  { %v91_v9 = vadd.f32 %v84_v7, %v25_v6  ;;  %v132_v10 = vpop.f32.mrb[1].mxu0 }
  0xde   :  { %v87_v11 = vpop.f32.mrb[2].mxu0 }
  0xdf   :  { %93 = vst.msk [vmem:[#allocation2] sm:$0xff] %vm22_vm0, %v91_v9  ;;  %v92_v12 = vadd.f32 %v87_v11, %v26_v8  ;;  %v133_v13 = vpop.f32.mrb[3].mxu0 }
  0xe1   :  { %94 = vst.msk [vmem:[#allocation2 + $0x8] sm:$0xff] %vm22_vm0, %v92_v12 }
  0xe6   :  { %v98_v15 = vld [vmem:[#allocation2] sm:$0xff] }
  0xe7   :  { %v107_v17 = vadd.f32 %v122_v14, %v98_v15 }
  0xe8   :  { %v99_v18 = vld [vmem:[#allocation2 + $0x8] sm:$0xff] }
  0xe9   :  { %v111_v20 = vadd.f32 %v109_v16, %v107_v17  ;;  %v108_v21 = vadd.f32 %v122_v14, %v99_v18 }
  0xeb   :  { %113 = vst.msk [vmem:[%s203_s4] sm:$0xff] %vm22_vm0, %v111_v20  ;;  %v112_v22 = vadd.f32 %v110_v19, %v108_v21 }
  0xed   :  { %114 = vst.msk [vmem:[%s203_s4 + $0x8] sm:$0xff] %vm22_vm0, %v112_v22 }

// kernel: decoder_block_forward.8
= control target key start
LH: loop header
LB: loop body
LE: loop exit
PB: predicated region body
PF: predicated region fallthrough
CT: control target
= control target key end

     0   :  { %vm31_vm0 = vcmask 261120   ;;  %v185_v15 = vmov 0.0   ;;  %vm186_vm1 = vmmov 0   ;;  %vm151_vm6 = vcmask 785408   ;;  %s250_s0 = inlined_call_operand.vmem [shape: f32[16,32], index: 0, kind: input, shape index: {}]   ;;  %s251_s1 = inlined_call_operand.vmem [shape: bf16[32,96], index: 1, kind: input, shape index: {}]   ;;  %s252_s3 = inlined_call_operand.<no memory space> [shape: f32[1,1], index: 3, kind: input, shape index: {}]   ;;  %s253_s4 = inlined_call_operand.<no memory space> [shape: f32[1,1], index: 4, kind: input, shape index: {}]   ;;  %s254_s2 = inlined_call_operand.vmem [shape: f32[1,96], index: 2, kind: input, shape index: {}]   ;;  %s255_s5 = inlined_call_operand.vmem [shape: f32[16,96], index: 5, kind: output, shape index: {}]  }
   0x1   :  { %v27_v0 = vld [vmem:[%s250_s0] sm:$0xff]  ;;  %v28_v1 = vld [vmem:[%s250_s0 + $0x8] sm:$0xff]  ;;  %165 = vmatprep.subr.bf16.mxu0 %v185_v15  ;;  %169 = vmatprep.mubr.msk.bf16.mxu0 %vm186_vm1, %v185_v15  ;;  %v68_v33 = vstv %s252_s3  ;;  %v77_v39 = vstv %s253_s4 }
   0x2   :  { %v32_v2 = vsel %vm31_vm0, %v27_v0, 0.0  ;;  %v35_v3 = vsel %vm31_vm0, %v28_v1, 0.0  ;;  %v175_v14 = vld [vmem:[%s251_s1] sm:$0xff]   ;;  %v176_v16 = vld [vmem:[%s251_s1 + $0x8] sm:$0xff]  }
   0x3   :  { %33 = vadd.xlane.f32.xlu0 %v32_v2  ;;  %166 = vmatpush3.bf16.msra.mxu0 %v175_v14  ;;  %v158_v45 = vld [vmem:[%s254_s2] ss:$0 sm:$0xff] }
   0x4   :  { %167 = vmatprep.subr.bf16.mxu0 %v185_v15 }
   0x7   :  { %36 = vadd.xlane.f32.xlu0 %v35_v3  ;;  %168 = vmatpush3.bf16.msra.mxu0 %v176_v16 }
  0x90   :  { %v34_v4 = vpop.xlane.xlu0 %33 }
  0x91   :  { %v39_v5 = vmul.f32 0.03125, %v34_v4 }
  0x93   :  { %v41_v6 = vsub.f32 %v27_v0, %v39_v5 }
  0x94   :  { %v37_v7 = vpop.xlane.xlu0 %36 }
  0x95   :  { %v40_v8 = vmul.f32 0.03125, %v37_v7  ;;  %v43_v9 = vmul.f32 %v41_v6, %v41_v6  ;;  %v69_v35 = vmul.f32 %v68_v33, %v41_v6 }
  0x97   :  { %v42_v10 = vsub.f32 %v28_v1, %v40_v8  ;;  %v45_v11 = vsel %vm31_vm0, %v43_v9, 0.0 }
  0x98   :  { %46 = vadd.xlane.f32.xlu1 %v45_v11 }
  0x99   :  { %v44_v12 = vmul.f32 %v42_v10, %v42_v10  ;;  %v70_v36 = vmul.f32 %v68_v33, %v42_v10 }
  0x9b   :  { %v48_v13 = vsel %vm31_vm0, %v44_v12, 0.0 }
  0x9c   :  { %49 = vadd.xlane.f32.xlu1 %v48_v13 }
 0x125   :  { %v47_v17 = vpop.xlane.xlu1 %46 }
 0x126   :  { %v52_v18 = vmul.f32 0.032258064, %v47_v17 }
 0x128   :  { %177 = vrsqrt.f32 %v52_v18  ;;  %vm56_vm2 = vcmp.eq.f32.partialorder %v52_v18, inf  ;;  %v59_v23 = vand.u32 2147483648, %v52_v18  ;;  %vm58_vm3 = vcmp.eq.f32.partialorder %v52_v18, 0.0 }
 0x129   :  { %v50_v19 = vpop.xlane.xlu1 %49 }
 0x12a   :  { %v53_v20 = vmul.f32 0.032258064, %v50_v19 }
 0x12c   :  { %179 = vrsqrt.f32 %v53_v20  ;;  %vm63_vm4 = vcmp.eq.f32.partialorder %v53_v20, inf  ;;  %v66_v29 = vand.u32 2147483648, %v53_v20  ;;  %vm65_vm5 = vcmp.eq.f32.partialorder %v53_v20, 0.0 }
 0x132   :  { %v178_v21 = vpop.eup %177 }
 0x133   :  { %v55_v22 = vmul.f32 %v178_v21, %v52_v18 }
 0x135   :  { %v57_v24 = vsel %vm56_vm2, %v52_v18, %v55_v22 }
 0x136   :  { %v180_v25 = vpop.eup %179  ;;  %v60_v26 = vsel %vm58_vm3, %v59_v23, %v57_v24 }
 0x137   :  { %v71_v27 = vadd.f32 1e-06, %v60_v26  ;;  %v62_v28 = vmul.f32 %v180_v25, %v53_v20 }
 0x139   :  { %181 = vrcp.f32 %v71_v27  ;;  %v64_v30 = vsel %vm63_vm4, %v53_v20, %v62_v28 }
 0x13a   :  { %v67_v31 = vsel %vm65_vm5, %v66_v29, %v64_v30 }
 0x13b   :  { %v72_v32 = vadd.f32 1e-06, %v67_v31 }
 0x13d   :  { %183 = vrcp.f32 %v72_v32 }
 0x143   :  { %v182_v34 = vpop.eup %181 }
 0x144   :  { %v74_v37 = vmul.f32 %v182_v34, %v69_v35 }
 0x146   :  { %v78_v41 = vadd.f32 %v77_v39, %v74_v37 }
 0x147   :  { %v184_v38 = vpop.eup %183 }
 0x148   :  { %v76_v40 = vmul.f32 %v184_v38, %v70_v36 }
 0x14a   :  { %v79_v42 = vadd.f32 %v77_v39, %v76_v40 }
 0x14c   :  { %v80_v43 = vpack.c.bf16 %v79_v42, %v78_v41 }
 0x14e   :  { %81 = vst.msk [vmem:[#allocation2] sm:$0xff] %vm31_vm0, %v80_v43 }
 0x155   :  { %v82_v44 = vld [vmem:[#allocation2] sm:$0xff] }
 0x156   :  { %170 = vmatmul.mubr.msk.bf16.vlgmr.msra.gmra.mrb[0].mxu0 %vm31_vm0, %v82_v44 }
 0x229   :  { %v144_v46 = vpop.f32.mrb[0].mxu0 }
 0x22a   :  { %v145_v47 = vadd.f32 %v158_v45, %v144_v46  ;;  %v171_v48 = vpop.f32.mrb[1].mxu0 }
 0x22b   :  { %v147_v49 = vpop.f32.mrb[2].mxu0 }
 0x22c   :  { %152 = vst.msk [vmem:[%s255_s5] sm:$0xff] %vm151_vm6, %v145_v47  ;;  %v148_v50 = vadd.f32 %v158_v45, %v147_v49  ;;  %v172_v51 = vpop.f32.mrb[3].mxu0 }
 0x22e   :  { %153 = vst.msk [vmem:[%s255_s5 + $0x8] sm:$0xff] %vm151_vm6, %v148_v50 }

// kernel: decoder_block_forward.11
= control target key start
LH: loop header
LB: loop body
LE: loop exit
PB: predicated region body
PF: predicated region fallthrough
CT: control target
= control target key end

     0   :  { %vm31_vm0 = vcmask 261120   ;;  %v184_v15 = vmov 0.0   ;;  %vm185_vm1 = vmmov 0   ;;  %s251_s0 = inlined_call_operand.vmem [shape: f32[16,32], index: 0, kind: input, shape index: {}]   ;;  %s252_s1 = inlined_call_operand.vmem [shape: bf16[32,32], index: 1, kind: input, shape index: {}]   ;;  %s253_s3 = inlined_call_operand.<no memory space> [shape: f32[1,1], index: 3, kind: input, shape index: {}]   ;;  %s254_s4 = inlined_call_operand.<no memory space> [shape: f32[1,1], index: 4, kind: input, shape index: {}]   ;;  %s255_s2 = inlined_call_operand.vmem [shape: f32[1,32], index: 2, kind: input, shape index: {}]   ;;  %s256_s5 = inlined_call_operand.vmem [shape: f32[16,32], index: 5, kind: output, shape index: {}]  }
   0x1   :  { %v27_v0 = vld [vmem:[%s251_s0] sm:$0xff]  ;;  %v28_v1 = vld [vmem:[%s251_s0 + $0x8] sm:$0xff]  ;;  %164 = vmatprep.subr.bf16.mxu0 %v184_v15  ;;  %168 = vmatprep.mubr.msk.bf16.mxu0 %vm185_vm1, %v184_v15  ;;  %v68_v33 = vstv %s253_s3  ;;  %v77_v39 = vstv %s254_s4 }
   0x2   :  { %v32_v2 = vsel %vm31_vm0, %v27_v0, 0.0  ;;  %v35_v3 = vsel %vm31_vm0, %v28_v1, 0.0  ;;  %v174_v14 = vld [vmem:[%s252_s1] sm:$0xff]   ;;  %v175_v16 = vld [vmem:[%s252_s1 + $0x8] sm:$0xff]  }
   0x3   :  { %33 = vadd.xlane.f32.xlu0 %v32_v2  ;;  %165 = vmatpush3.bf16.msra.mxu0 %v174_v14  ;;  %v157_v45 = vld [vmem:[%s255_s2] ss:$0 sm:$0xff] }
   0x4   :  { %166 = vmatprep.subr.bf16.mxu0 %v184_v15 }
   0x7   :  { %36 = vadd.xlane.f32.xlu0 %v35_v3  ;;  %167 = vmatpush3.bf16.msra.mxu0 %v175_v16 }
  0x90   :  { %v34_v4 = vpop.xlane.xlu0 %33 }
  0x91   :  { %v39_v5 = vmul.f32 0.03125, %v34_v4 }
  0x93   :  { %v41_v6 = vsub.f32 %v27_v0, %v39_v5 }
  0x94   :  { %v37_v7 = vpop.xlane.xlu0 %36 }
  0x95   :  { %v40_v8 = vmul.f32 0.03125, %v37_v7  ;;  %v43_v9 = vmul.f32 %v41_v6, %v41_v6  ;;  %v69_v35 = vmul.f32 %v68_v33, %v41_v6 }
  0x97   :  { %v42_v10 = vsub.f32 %v28_v1, %v40_v8  ;;  %v45_v11 = vsel %vm31_vm0, %v43_v9, 0.0 }
  0x98   :  { %46 = vadd.xlane.f32.xlu1 %v45_v11 }
  0x99   :  { %v44_v12 = vmul.f32 %v42_v10, %v42_v10  ;;  %v70_v36 = vmul.f32 %v68_v33, %v42_v10 }
  0x9b   :  { %v48_v13 = vsel %vm31_vm0, %v44_v12, 0.0 }
  0x9c   :  { %49 = vadd.xlane.f32.xlu1 %v48_v13 }
 0x125   :  { %v47_v17 = vpop.xlane.xlu1 %46 }
 0x126   :  { %v52_v18 = vmul.f32 0.032258064, %v47_v17 }
 0x128   :  { %176 = vrsqrt.f32 %v52_v18  ;;  %vm56_vm2 = vcmp.eq.f32.partialorder %v52_v18, inf  ;;  %v59_v23 = vand.u32 2147483648, %v52_v18  ;;  %vm58_vm3 = vcmp.eq.f32.partialorder %v52_v18, 0.0 }
 0x129   :  { %v50_v19 = vpop.xlane.xlu1 %49 }
 0x12a   :  { %v53_v20 = vmul.f32 0.032258064, %v50_v19 }
 0x12c   :  { %178 = vrsqrt.f32 %v53_v20  ;;  %vm63_vm4 = vcmp.eq.f32.partialorder %v53_v20, inf  ;;  %v66_v29 = vand.u32 2147483648, %v53_v20  ;;  %vm65_vm5 = vcmp.eq.f32.partialorder %v53_v20, 0.0 }
 0x132   :  { %v177_v21 = vpop.eup %176 }
 0x133   :  { %v55_v22 = vmul.f32 %v177_v21, %v52_v18 }
 0x135   :  { %v57_v24 = vsel %vm56_vm2, %v52_v18, %v55_v22 }
 0x136   :  { %v179_v25 = vpop.eup %178  ;;  %v60_v26 = vsel %vm58_vm3, %v59_v23, %v57_v24 }
 0x137   :  { %v71_v27 = vadd.f32 1e-06, %v60_v26  ;;  %v62_v28 = vmul.f32 %v179_v25, %v53_v20 }
 0x139   :  { %180 = vrcp.f32 %v71_v27  ;;  %v64_v30 = vsel %vm63_vm4, %v53_v20, %v62_v28 }
 0x13a   :  { %v67_v31 = vsel %vm65_vm5, %v66_v29, %v64_v30 }
 0x13b   :  { %v72_v32 = vadd.f32 1e-06, %v67_v31 }
 0x13d   :  { %182 = vrcp.f32 %v72_v32 }
 0x143   :  { %v181_v34 = vpop.eup %180 }
 0x144   :  { %v74_v37 = vmul.f32 %v181_v34, %v69_v35 }
 0x146   :  { %v78_v41 = vadd.f32 %v77_v39, %v74_v37 }
 0x147   :  { %v183_v38 = vpop.eup %182 }
 0x148   :  { %v76_v40 = vmul.f32 %v183_v38, %v70_v36 }
 0x14a   :  { %v79_v42 = vadd.f32 %v77_v39, %v76_v40 }
 0x14c   :  { %v80_v43 = vpack.c.bf16 %v79_v42, %v78_v41 }
 0x14e   :  { %81 = vst.msk [vmem:[#allocation2] sm:$0xff] %vm31_vm0, %v80_v43 }
 0x155   :  { %v82_v44 = vld [vmem:[#allocation2] sm:$0xff] }
 0x156   :  { %169 = vmatmul.mubr.msk.bf16.vlgmr.msra.gmra.mrb[0].mxu0 %vm31_vm0, %v82_v44 }
 0x229   :  { %v144_v46 = vpop.f32.mrb[0].mxu0 }
 0x22a   :  { %v145_v47 = vadd.f32 %v157_v45, %v144_v46  ;;  %v170_v48 = vpop.f32.mrb[1].mxu0 }
 0x22b   :  { %v147_v49 = vpop.f32.mrb[2].mxu0 }
 0x22c   :  { %151 = vst.msk [vmem:[%s256_s5] sm:$0xff] %vm31_vm0, %v145_v47  ;;  %v148_v50 = vadd.f32 %v157_v45, %v147_v49  ;;  %v171_v51 = vpop.f32.mrb[3].mxu0 }
 0x22e   :  { %152 = vst.msk [vmem:[%s256_s5 + $0x8] sm:$0xff] %vm31_vm0, %v148_v50 }

// kernel: decoder_block_forward.9
= control target key start
LH: loop header
LB: loop body
LE: loop exit
PB: predicated region body
PF: predicated region fallthrough
CT: control target
= control target key end

     0   :  { %s1271_s15 = smov 0   ;;  %s1273_s16 = smov 0   ;;  %s1467_s0 = inlined_call_operand.vmem [shape: f32[1,8,8], index: 0, kind: input, shape index: {}]   ;;  %s1468_s1 = inlined_call_operand.vmem [shape: f32[2,4,8,8], index: 1, kind: input, shape index: {}]   ;;  %s1469_s2 = inlined_call_operand.vmem [shape: f32[2,4,8,8], index: 2, kind: input, shape index: {}]   ;;  %s1470_s3 = inlined_call_operand.vmem [shape: f32[2,4,8,8], index: 3, kind: input, shape index: {}]   ;;  %s1471_s4 = inlined_call_operand.vmem [shape: f32[2,4,8,8], index: 4, kind: output, shape index: {}]  }
   0x1   :  { %s1275_s17 = smov 0  }
   0x2 LB: > { %s33_s18 = sadd.s32 1, %s1236_s16  ;;  %p1077_p0 = scmp.ge.s32.totalorder %s1240_s17, 1  ;;  %s1240_s17 = sphi %s1275_s17, %s14_s17   ;;  %s1236_s16 = sphi %s1273_s16, %s1473_s16   ;;  %s1232_s15 = sphi %s1271_s15, %s1472_s15  }
   0x3   : > { %p35_p1 = scmp.ge.s32.totalorder %s33_s18, 2  ;;  %p232_p2 = scmp.lt.s32.totalorder %s1240_s17, 3 }
   0x5   : > { %s1475_s18 = smov (%p35_p1, %s33_s18), 0  ;;  %p233_p3 = pnand %p1077_p0, %p232_p2 }
   0x6   : > { %p294_p4 = scmp.lt.s32.totalorder (!%p233_p3), %s1232_s15, 1  ;;  %vm340_vm0 = vcmask (!%p233_p3), 64512   ;;  %v1242_v0 = vmov (!%p233_p3), 0.0   ;;  %vm1243_vm1 = vmmov (!%p233_p3), 0   ;;  %vm331_vm2 = vcmask (!%p233_p3), 7168   ;;  %v558_v26 = vld [vmem:[%s1467_s0] sm:$0xff] (!%p233_p3) }
   0x7   : > { %236 = sbr.rel (%p233_p3) target bundleno = 836 (0x344), region = 36  ;;  %1116 = vmatprep.subr.bf16.mxu0 (!%p233_p3), %v1242_v0  ;;  %341 = vst.msk [vmem:[#allocation4] sm:$0xff] (!%p233_p3), %vm340_vm0, %v1242_v0  ;;  %342 = vst.msk [vmem:[#allocation4 + $0x8] sm:$0xff] (!%p233_p3), %vm340_vm0, %v1242_v0  ;;  %1122 = vmatprep.subr.bf16.mxu1 (!%p233_p3), %v1242_v0  ;;  %v1244_v25 = vmov (!%p233_p3), -inf   ;;  %vm559_vm3 = vcmp.eq.f32.partialorder (!%p233_p3), %v558_v26, 0.0  ;;  %v1245_v51 = vmov (!%p233_p3), 0  }
   0x8   : > { %343 = vst.msk [vmem:[#allocation4 + $0x10] sm:$0xff] (!%p233_p3), %vm340_vm0, %v1242_v0  ;;  %344 = vst.msk [vmem:[#allocation4 + $0x18] sm:$0xff] (!%p233_p3), %vm340_vm0, %v1242_v0  ;;  %1118 = vmatprep.mubr.msk.bf16.mxu0 (!%p233_p3), %vm1243_vm1, %v1242_v0  ;;  %1124 = vmatprep.mubr.msk.bf16.mxu1 (!%p233_p3), %vm1243_vm1, %v1242_v0  ;;  %vm694_vm4 = vcmask (!%p233_p3), 1043456  }
   0x9   : > { %332 = vst.msk [vmem:[#allocation2] sm:$0xff] (!%p233_p3), %vm331_vm2, %v1244_v25  ;;  %333 = vst.msk [vmem:[#allocation2 + $0x8] sm:$0xff] (!%p233_p3), %vm331_vm2, %v1244_v25  ;;  %1192 = vset.pattern.permute.xlu0 (!%p233_p3), %v1245_v51  ;;  %1193 = vset.pattern.permute.xlu1 (!%p233_p3), %v1245_v51 }
   0xa   : > { %334 = vst.msk [vmem:[#allocation2 + $0x10] sm:$0xff] (!%p233_p3), %vm331_vm2, %v1244_v25  ;;  %335 = vst.msk [vmem:[#allocation2 + $0x18] sm:$0xff] (!%p233_p3), %vm331_vm2, %v1244_v25 }
   0xb   : > { %336 = vst.msk [vmem:[#allocation3] sm:$0xff] (!%p233_p3), %vm331_vm2, %v1242_v0  ;;  %337 = vst.msk [vmem:[#allocation3 + $0x8] sm:$0xff] (!%p233_p3), %vm331_vm2, %v1242_v0 }
   0xc   : > { %338 = vst.msk [vmem:[#allocation3 + $0x10] sm:$0xff] (!%p233_p3), %vm331_vm2, %v1242_v0  ;;  %339 = vst.msk [vmem:[#allocation3 + $0x18] sm:$0xff] (!%p233_p3), %vm331_vm2, %v1242_v0 }
   0xe   : > { %s1477_s15 = smov (!%p294_p4, %s1232_s15), 1 }
   0xf   : > { %s1303_s19 = sshll.u32 %s1477_s15, 5 }
  0x10   : > { %s309_s22 = scalar_lea.vmem %s1469_s2, %s1303_s19  ;;  %s301_s25 = scalar_lea.vmem %s1468_s1, %s1303_s19  ;;  %v1368_v52 = vld [vmem:[#allocation2] sm:$0xff]  ;;  %v1373_v55 = vld [vmem:[#allocation2 + $0x8] sm:$0xff] }
  0x11   : > { %v357_v1 = vld [vmem:[%s309_s22] sm:$0xff]  ;;  %v358_v2 = vld [vmem:[%s309_s22 + $0x8] sm:$0xff]  ;;  %v359_v7 = vld [vmem:[%s309_s22 + $0x10] sm:$0xff]  ;;  %s317_s30 = scalar_lea.vmem %s1470_s3, %s1303_s19  ;;  %s325_s7 = scalar_lea.vmem %s1471_s4, %s1303_s19 }
  0x12   : > { %v345_v3 = vld [vmem:[%s301_s25] sm:$0xff]  ;;  %v361_v4 = vpack.c.bf16 %v357_v1, %v357_v1  ;;  %v362_v5 = vpack.c.bf16 %v358_v2, %v358_v2  ;;  %v346_v6 = vld [vmem:[%s301_s25 + $0x8] sm:$0xff]  ;;  %v360_v8 = vld [vmem:[%s309_s22 + $0x18] sm:$0xff]  ;;  %v363_v13 = vpack.c.bf16 %v359_v7, %v359_v7 }
  0x13   : > { %v349_v11 = vmul.f32 0.35355338, %v345_v3  ;;  %v350_v12 = vmul.f32 0.35355338, %v346_v6  ;;  %v364_v14 = vpack.c.bf16 %v360_v8, %v360_v8  ;;  %v347_v17 = vld [vmem:[%s301_s25 + $0x10] sm:$0xff]  ;;  %v348_v18 = vld [vmem:[%s301_s25 + $0x18] sm:$0xff] }
  0x14   : > { %v378_v9 = vsel %vm340_vm0, %v361_v4, 0  ;;  %v424_v10 = vsel %vm340_vm0, %v362_v5, 0  ;;  %v470_v19 = vsel %vm340_vm0, %v363_v13, 0  ;;  %v351_v21 = vmul.f32 0.35355338, %v347_v17  ;;  %v1383_v59 = vld [vmem:[#allocation2 + $0x10] sm:$0xff] }
  0x15   : > { %1117 = vmatpush3.bf16.xpose.msra.mxu0 %v378_v9  ;;  %1123 = vmatpush3.bf16.xpose.msra.mxu1 %v424_v10  ;;  %v353_v15 = vpack.c.bf16 %v349_v11, %v349_v11  ;;  %v354_v16 = vpack.c.bf16 %v350_v12, %v350_v12  ;;  %v516_v20 = vsel %vm340_vm0, %v364_v14, 0  ;;  %v352_v22 = vmul.f32 0.35355338, %v348_v18  ;;  %v1393_v63 = vld [vmem:[#allocation2 + $0x18] sm:$0xff]  ;;  %v365_v4 = vld [vmem:[%s317_s30] sm:$0xff]  ;;  %v366_v8 = vld [vmem:[%s317_s30 + $0x8] sm:$0xff] }
  0x16   : > { %1128 = vmatprep.subr.bf16.mxu0 %v1242_v0  ;;  %1134 = vmatprep.subr.bf16.mxu1 %v1242_v0  ;;  %v355_v23 = vpack.c.bf16 %v351_v21, %v351_v21  ;;  %v369_v5 = vpack.c.bf16 %v365_v4, %v365_v4  ;;  %v370_v9 = vpack.c.bf16 %v366_v8, %v366_v8  ;;  %v367_v11 = vld [vmem:[%s317_s30 + $0x10] sm:$0xff]  ;;  %v368_v14 = vld [vmem:[%s317_s30 + $0x18] sm:$0xff]  ;;  %v631_v51 = vld [vmem:[#allocation3 + $0x8] sm:$0xff] }
  0x17   : > { %v356_v24 = vpack.c.bf16 %v352_v22, %v352_v22  ;;  %v371_v12 = vpack.c.bf16 %v367_v11, %v367_v11 }
  0x18   : > { %v696_v7 = vsel %vm694_vm4, %v369_v5, 0  ;;  %v742_v10 = vsel %vm694_vm4, %v370_v9, 0  ;;  %v659_v9 = vld [vmem:[#allocation4] sm:$0xff] }
  0x19   : > { %v788_v13 = vsel %vm694_vm4, %v371_v12, 0  ;;  %v660_v12 = vld [vmem:[#allocation4 + $0x8] sm:$0xff] }
  0x1c   : > { %1119 = vmatmul.mubr.msk.bf16.vlgmr.msra.gmra.mrb[0].mxu0 %vm340_vm0, %v353_v15  ;;  %1125 = vmatmul.mubr.msk.bf16.vlgmr.msra.gmra.mrb[0].mxu1 %vm340_vm0, %v354_v16  ;;  %v372_v15 = vpack.c.bf16 %v368_v14, %v368_v14 }
  0x1d   : > { %1129 = vmatpush3.bf16.xpose.msra.mxu0 %v470_v19  ;;  %1135 = vmatpush3.bf16.xpose.msra.mxu1 %v516_v20 }
  0x1e   : > { %1130 = vmatprep.mubr.msk.bf16.mxu0 %vm1243_vm1, %v1242_v0  ;;  %1136 = vmatprep.mubr.msk.bf16.mxu1 %vm1243_vm1, %v1242_v0  ;;  %v834_v16 = vsel %vm694_vm4, %v372_v15, 0 }
  0x1f   : > { %1140 = vmatprep.subr.bf16.mxu0 %v1242_v0  ;;  %1146 = vmatprep.subr.bf16.mxu1 %v1242_v0 }
  0x24   : > { %1131 = vmatmul.mubr.msk.bf16.vlgmr.msra.gmra.mrb[4].mxu0 %vm340_vm0, %v355_v23  ;;  %1137 = vmatmul.mubr.msk.bf16.vlgmr.msra.gmra.mrb[4].mxu1 %vm340_vm0, %v356_v24 }
  0x25   : > { %1142 = vmatprep.mubr.msk.bf16.mxu0 %vm1243_vm1, %v1242_v0  ;;  %1148 = vmatprep.mubr.msk.bf16.mxu1 %vm1243_vm1, %v1242_v0 }
  0x26   : > { %1141 = vmatpush3.bf16.msra.mxu0 %v696_v7  ;;  %1147 = vmatpush3.bf16.msra.mxu1 %v742_v10 }
  0x27   : > { %1152 = vmatprep.subr.bf16.mxu0 %v1242_v0  ;;  %1158 = vmatprep.subr.bf16.mxu1 %v1242_v0 }
  0xef   : > { %v414_v27 = vpop.f32.mrb[0].mxu0  ;;  %v460_v28 = vpop.f32.mrb[0].mxu1 }
  0xf0   : > { %v1349_v29 = vsel %vm559_vm3, -1e+09, %v414_v27  ;;  %v1120_v30 = vpop.f32.mrb[1].mxu0  ;;  %v1352_v31 = vsel %vm559_vm3, -1e+09, %v460_v28  ;;  %v1126_v32 = vpop.f32.mrb[1].mxu1 }
  0xf1   : > { %v417_v33 = vpop.f32.mrb[2].mxu0  ;;  %v570_v34 = vsel %vm340_vm0, %v1349_v29, -inf  ;;  %v463_v35 = vpop.f32.mrb[2].mxu1  ;;  %v573_v38 = vsel %vm340_vm0, %v1352_v31, -inf }
  0xf2   : > { %571 = vmax.xlane.f32.xlu0 %v570_v34  ;;  %v1121_v36 = vpop.f32.mrb[3].mxu0  ;;  %v1127_v37 = vpop.f32.mrb[3].mxu1 }
  0xf6   : > { %574 = vmax.xlane.f32.xlu0 %v573_v38 }
  0xf7   : > { %v506_v39 = vpop.f32.mrb[4].mxu0  ;;  %v552_v40 = vpop.f32.mrb[4].mxu1 }
  0xf8   : > { %v1359_v41 = vsel %vm559_vm3, -1e+09, %v506_v39  ;;  %v1132_v42 = vpop.f32.mrb[5].mxu0  ;;  %v1362_v43 = vsel %vm559_vm3, -1e+09, %v552_v40  ;;  %v1138_v44 = vpop.f32.mrb[5].mxu1 }
  0xf9   : > { %v509_v45 = vpop.f32.mrb[6].mxu0  ;;  %v576_v46 = vsel %vm340_vm0, %v1359_v41, -inf  ;;  %v555_v47 = vpop.f32.mrb[6].mxu1  ;;  %v579_v50 = vsel %vm340_vm0, %v1362_v43, -inf }
  0xfa   : > { %577 = vmax.xlane.f32.xlu1 %v576_v46  ;;  %v1133_v48 = vpop.f32.mrb[7].mxu0  ;;  %v1139_v49 = vpop.f32.mrb[7].mxu1 }
  0xfb   : > { %v630_v48 = vld [vmem:[#allocation3] sm:$0xff] }
  0xfe   : > { %580 = vmax.xlane.f32.xlu1 %v579_v50 }
 0x17f   : > { %v572_v53 = vpop.xlane.xlu0 %571 }
 0x180   : > { %v1371_v54 = vmax.f32 %v1368_v52, %v572_v53 }
 0x182   : > { %v586_v56 = vsub.f32 %v1368_v52, %v1371_v54  ;;  %884 = vst.msk [vmem:[#allocation2] sm:$0xff] %vm331_vm2, %v1371_v54  ;;  %600 = vperm.xlu0 %1192, %v1371_v54  }
 0x183   : > { %v575_v57 = vpop.xlane.xlu0 %574 }
 0x184   : > { %v1381_v58 = vmax.f32 %v1373_v55, %v575_v57 }
 0x186   : > { %v587_v60 = vsub.f32 %v1373_v55, %v1381_v58  ;;  %885 = vst.msk [vmem:[#allocation2 + $0x8] sm:$0xff] %vm331_vm2, %v1381_v58  ;;  %605 = vperm.xlu1 %1193, %v1381_v58   ;;  %v632_v55 = vld [vmem:[#allocation3 + $0x10] sm:$0xff] }
 0x187   : > { %v578_v61 = vpop.xlane.xlu1 %577 }
 0x188   : > { %v1391_v62 = vmax.f32 %v1383_v59, %v578_v61  ;;  %v592_v39 = vmul.f32 1.442695, %v587_v60 }
 0x18a   : > { %v588_v1 = vsub.f32 %v1383_v59, %v1391_v62  ;;  %886 = vst.msk [vmem:[#allocation2 + $0x10] sm:$0xff] %vm331_vm2, %v1391_v62  ;;  %610 = vperm.xlu1 %1193, %v1391_v62   ;;  %v633_v59 = vld [vmem:[#allocation3 + $0x18] sm:$0xff] }
 0x18b   : > { %v581_v2 = vpop.xlane.xlu1 %580 }
 0x18c   : > { %v1405_v3 = vmax.f32 %v1393_v63, %v581_v2  ;;  %v594_v42 = vmul.f32 1.442695, %v588_v1 }
 0x18e   : > { %v589_v6 = vsub.f32 %v1393_v63, %v1405_v3  ;;  %887 = vst.msk [vmem:[#allocation2 + $0x18] sm:$0xff] %vm331_vm2, %v1405_v3  ;;  %615 = vperm.xlu1 %1193, %v1405_v3  }
 0x201   : > { %v601_v17 = vpop.permute.xlu0 %600 }
 0x202   : > { %v618_v18 = vsub.f32 %v1349_v29, %v601_v17 }
 0x204   : > { %v622_v19 = vmul.f32 1.442695, %v618_v18 }
 0x205   : > { %v606_v20 = vpop.permute.xlu1 %605 }
 0x206   : > { %1194 = vpow2.f32 %v622_v19  ;;  %v619_v21 = vsub.f32 %v1352_v31, %v606_v20 }
 0x208   : > { %v624_v22 = vmul.f32 1.442695, %v619_v21  ;;  %v661_v21 = vld [vmem:[#allocation4 + $0x10] sm:$0xff] }
 0x209   : > { %v611_v23 = vpop.permute.xlu1 %610 }
 0x20a   : > { %1196 = vpow2.f32 %v624_v22  ;;  %v620_v24 = vsub.f32 %v1359_v41, %v611_v23 }
 0x20c   : > { %v626_v25 = vmul.f32 1.442695, %v620_v24 }
 0x20d   : > { %v616_v26 = vpop.permute.xlu1 %615 }
 0x20e   : > { %1198 = vpow2.f32 %v626_v25  ;;  %v621_v27 = vsub.f32 %v1362_v43, %v616_v26  ;;  %v596_v43 = vmul.f32 1.442695, %v589_v6 }
 0x210   : > { %v1195_v28 = vpop.eup %1194  ;;  %v628_v30 = vmul.f32 1.442695, %v621_v27 }
 0x211   : > { %v638_v32 = vsel %vm340_vm0, %v1195_v28, 0.0  ;;  %v687_v29 = vpack.c.bf16 %v1195_v28, %v1195_v28  ;;  %v662_v28 = vld [vmem:[#allocation4 + $0x18] sm:$0xff] }
 0x212   : > { %1200 = vpow2.f32 %v628_v30  ;;  %639 = vadd.xlane.f32.xlu1 %v638_v32 }
 0x213   : > { %1143 = vmatmul.mubr.msk.bf16.vlgmr.msra.gmra.mrb[8].mxu0 %vm340_vm0, %v687_v29  ;;  %1202 = vpow2.f32 %v592_v39 }
 0x214   : > { %v1197_v31 = vpop.eup %1196  ;;  %1153 = vmatpush3.bf16.msra.mxu0 %v788_v13  ;;  %1154 = vmatprep.mubr.msk.bf16.mxu0 %vm1243_vm1, %v1242_v0 }
 0x215   : > { %v641_v33 = vsel %vm340_vm0, %v1197_v31, 0.0  ;;  %v688_v34 = vpack.c.bf16 %v1197_v31, %v1197_v31 }
 0x216   : > { %642 = vadd.xlane.f32.xlu0 %v641_v33 }
 0x217   : > { %1149 = vmatmul.mubr.msk.bf16.vlgmr.msra.gmra.mrb[8].mxu1 %vm340_vm0, %v688_v34 }
 0x218   : > { %v1199_v35 = vpop.eup %1198  ;;  %1159 = vmatpush3.bf16.msra.mxu1 %v834_v16  ;;  %1160 = vmatprep.mubr.msk.bf16.mxu1 %vm1243_vm1, %v1242_v0  ;;  %v590_v0 = vmul.f32 1.442695, %v586_v56 }
 0x219   : > { %v644_v36 = vsel %vm340_vm0, %v1199_v35, 0.0  ;;  %v689_v37 = vpack.c.bf16 %v1199_v35, %v1199_v35 }
 0x21a   : > { %645 = vadd.xlane.f32.xlu1 %v644_v36  ;;  %1204 = vpow2.f32 %v590_v0 }
 0x21b   : > { %1155 = vmatmul.mubr.msk.bf16.vlgmr.msra.gmra.mrb[12].mxu0 %vm340_vm0, %v689_v37  ;;  %1206 = vpow2.f32 %v594_v42 }
 0x21c   : > { %v1201_v38 = vpop.eup %1200  ;;  %1208 = vpow2.f32 %v596_v43 }
 0x21d   : > { %v647_v40 = vsel %vm340_vm0, %v1201_v38, 0.0  ;;  %v690_v41 = vpack.c.bf16 %v1201_v38, %v1201_v38  ;;  %v1203_v44 = vpop.eup %1202 }
 0x21e   : > { %648 = vadd.xlane.f32.xlu1 %v647_v40  ;;  %v635_v53 = vmul.f32 %v1203_v44, %v631_v51 }
 0x21f   : > { %1161 = vmatmul.mubr.msk.bf16.vlgmr.msra.gmra.mrb[12].mxu1 %vm340_vm0, %v690_v41 }
 0x224   : > { %v1205_v45 = vpop.eup %1204 }
 0x225   : > { %v1207_v46 = vpop.eup %1206  ;;  %v634_v49 = vmul.f32 %v1205_v45, %v630_v48 }
 0x226   : > { %v1209_v47 = vpop.eup %1208  ;;  %v636_v57 = vmul.f32 %v1207_v46, %v632_v55 }
 0x227   : > { %v637_v62 = vmul.f32 %v1209_v47, %v633_v59 }
 0x22c   : > { %670 = vperm.xlu0 %1192, %v1203_v44  }
 0x22f   : > { %665 = vperm.xlu1 %1193, %v1205_v45  }
 0x233   : > { %675 = vperm.xlu1 %1193, %v1207_v46  }
 0x237   : > { %680 = vperm.xlu1 %1193, %v1209_v47  }
 0x29f   : > { %v640_v50 = vpop.xlane.xlu1 %639 }
 0x2a0   : > { %v650_v52 = vadd.f32 %v640_v50, %v634_v49 }
 0x2a2   : > { %655 = vst.msk [vmem:[#allocation3] sm:$0xff] %vm331_vm2, %v650_v52 }
 0x2a3   : > { %v643_v54 = vpop.xlane.xlu0 %642 }
 0x2a4   : > { %v651_v56 = vadd.f32 %v643_v54, %v635_v53 }
 0x2a6   : > { %656 = vst.msk [vmem:[#allocation3 + $0x8] sm:$0xff] %vm331_vm2, %v651_v56 }
 0x2a7   : > { %v646_v58 = vpop.xlane.xlu1 %645 }
 0x2a8   : > { %v652_v60 = vadd.f32 %v646_v58, %v636_v57 }
 0x2a9   : > { %v895_v61 = vld [vmem:[#allocation3] sm:$0xff] }
 0x2aa   : > { %657 = vst.msk [vmem:[#allocation3 + $0x10] sm:$0xff] %vm331_vm2, %v652_v60  ;;  %1210 = vrcp.f32 %v895_v61 }
 0x2ab   : > { %v649_v63 = vpop.xlane.xlu1 %648  ;;  %v671_v13 = vpop.permute.xlu0 %670 }
 0x2ac   : > { %v653_v1 = vadd.f32 %v649_v63, %v637_v62  ;;  %v684_v19 = vmul.f32 %v671_v13, %v660_v12 }
 0x2ad   : > { %v896_v2 = vld [vmem:[#allocation3 + $0x8] sm:$0xff] }
 0x2ae   : > { %658 = vst.msk [vmem:[#allocation3 + $0x18] sm:$0xff] %vm331_vm2, %v653_v1  ;;  %1212 = vrcp.f32 %v896_v2 }
 0x2af   : > { %v666_v10 = vpop.permute.xlu1 %665 }
 0x2b0   : > { %v683_v11 = vmul.f32 %v666_v10, %v659_v9 }
 0x2b1   : > { %v897_v3 = vld [vmem:[#allocation3 + $0x10] sm:$0xff] }
 0x2b2   : > { %1214 = vrcp.f32 %v897_v3 }
 0x2b3   : > { %v676_v17 = vpop.permute.xlu1 %675 }
 0x2b4   : > { %v1211_v4 = vpop.eup %1210  ;;  %v685_v26 = vmul.f32 %v676_v17, %v661_v21 }
 0x2b5   : > { %905 = vperm.xlu1 %1193, %v1211_v4   ;;  %v898_v5 = vld [vmem:[#allocation3 + $0x18] sm:$0xff] }
 0x2b6   : > { %1216 = vrcp.f32 %v898_v5 }
 0x2b7   : > { %v681_v30 = vpop.permute.xlu1 %680 }
 0x2b8   : > { %v1213_v6 = vpop.eup %1212  ;;  %v686_v34 = vmul.f32 %v681_v30, %v662_v28 }
 0x2b9   : > { %910 = vperm.xlu0 %1192, %v1213_v6  }
 0x2bc   : > { %v1215_v7 = vpop.eup %1214 }
 0x2bd   : > { %915 = vperm.xlu1 %1193, %v1215_v7  }
 0x2c0   : > { %v1217_v8 = vpop.eup %1216 }
 0x2c1   : > { %920 = vperm.xlu0 %1192, %v1217_v8  }
 0x2e6   : > { %v732_v14 = vpop.f32.mrb[8].mxu0 }
 0x2e7   : > { %v876_v15 = vadd.f32 %v732_v14, %v683_v11  ;;  %v1144_v16 = vpop.f32.mrb[9].mxu0 }
 0x2e8   : > { %v735_v18 = vpop.f32.mrb[10].mxu0 }
 0x2e9   : > { %880 = vst.msk [vmem:[#allocation4] sm:$0xff] %vm340_vm0, %v876_v15  ;;  %v1145_v20 = vpop.f32.mrb[11].mxu0 }
 0x2ea   : > { %v778_v22 = vpop.f32.mrb[8].mxu1 }
 0x2eb   : > { %v877_v23 = vadd.f32 %v778_v22, %v684_v19  ;;  %v1150_v24 = vpop.f32.mrb[9].mxu1 }
 0x2ec   : > { %v781_v25 = vpop.f32.mrb[10].mxu1 }
 0x2ed   : > { %881 = vst.msk [vmem:[#allocation4 + $0x8] sm:$0xff] %vm340_vm0, %v877_v23  ;;  %v1151_v27 = vpop.f32.mrb[11].mxu1 }
 0x2ee   : > { %v824_v32 = vpop.f32.mrb[12].mxu0 }
 0x2ef   : > { %v878_v29 = vadd.f32 %v824_v32, %v685_v26  ;;  %v1156_v31 = vpop.f32.mrb[13].mxu0 }
 0x2f0   : > { %v827_v33 = vpop.f32.mrb[14].mxu0  ;;  %v891_v0 = vld [vmem:[#allocation4] sm:$0xff] }
 0x2f1   : > { %882 = vst.msk [vmem:[#allocation4 + $0x10] sm:$0xff] %vm340_vm0, %v878_v29  ;;  %v1157_v35 = vpop.f32.mrb[15].mxu0 }
 0x2f2   : > { %v870_v36 = vpop.f32.mrb[12].mxu1 }
 0x2f3   : > { %v879_v37 = vadd.f32 %v870_v36, %v686_v34  ;;  %v1162_v38 = vpop.f32.mrb[13].mxu1 }
 0x2f4   : > { %v873_v39 = vpop.f32.mrb[14].mxu1  ;;  %v892_v43 = vld [vmem:[#allocation4 + $0x8] sm:$0xff] }
 0x2f5   : > { %883 = vst.msk [vmem:[#allocation4 + $0x18] sm:$0xff] %vm340_vm0, %v879_v37  ;;  %v1163_v40 = vpop.f32.mrb[15].mxu1 }
 0x2f8   : > { %v893_v47 = vld [vmem:[#allocation4 + $0x10] sm:$0xff] }
 0x2fc   : > { %v894_v50 = vld [vmem:[#allocation4 + $0x18] sm:$0xff] }
 0x334   : > { %v906_v41 = vpop.permute.xlu1 %905 }
 0x335   : > { %v923_v42 = vmul.f32 %v906_v41, %v891_v0 }
 0x337   : > { %927 = vst.msk [vmem:[%s325_s7] sm:$0xff] %vm340_vm0, %v923_v42 }
 0x338   : > { %v911_v44 = vpop.permute.xlu0 %910 }
 0x339   : > { %v924_v45 = vmul.f32 %v911_v44, %v892_v43 }
 0x33b   : > { %928 = vst.msk [vmem:[%s325_s7 + $0x8] sm:$0xff] %vm340_vm0, %v924_v45 }
 0x33c   : > { %v916_v46 = vpop.permute.xlu1 %915 }
 0x33d   : > { %v925_v48 = vmul.f32 %v916_v46, %v893_v47 }
 0x33f   : > { %929 = vst.msk [vmem:[%s325_s7 + $0x10] sm:$0xff] %vm340_vm0, %v925_v48 }
 0x340   : > { %v921_v49 = vpop.permute.xlu0 %920 }
 0x341   : > { %v926_v51 = vmul.f32 %v921_v49, %v894_v50 }
 0x343   : > { %930 = vst.msk [vmem:[%s325_s7 + $0x18] sm:$0xff] %vm340_vm0, %v926_v51 }
 0x344 PF: > { %s14_s17 = sadd.s32 1, %s1240_s17   ;;  %s1472_s15 = smov %s1236_s16 }
 0x345   : > { %p11_p5 = scmp.ge.s32.totalorder %s14_s17, 4   ;;  %s1473_s16 = smov %s1475_s18 }
 0x347   :  { %13 = sbr.rel (!%p11_p5) target bundleno = 2 (0x2), region = 83 }

// kernel: decoder_block_forward.12
= control target key start
LH: loop header
LB: loop body
LE: loop exit
PB: predicated region body
PF: predicated region fallthrough
CT: control target
= control target key end

     0   :  { %vm19_vm0 = vcmask 523264   ;;  %v132_v0 = vmov 0.0   ;;  %vm133_vm1 = vmmov 0   ;;  %vm43_vm2 = vcmask 261120   ;;  %s181_s1 = inlined_call_operand.vmem [shape: bf16[32,64], index: 1, kind: input, shape index: {}]   ;;  %s182_s0 = inlined_call_operand.vmem [shape: f32[16,32], index: 0, kind: input, shape index: {}]   ;;  %s183_s2 = inlined_call_operand.vmem [shape: f32[1,64], index: 2, kind: input, shape index: {}]   ;;  %s184_s3 = inlined_call_operand.vmem [shape: f32[16,64], index: 3, kind: output, shape index: {}]  }
   0x1   :  { %120 = vmatprep.subr.bf16.mxu0 %v132_v0  ;;  %v130_v1 = vld [vmem:[%s181_s1] sm:$0xff]   ;;  %124 = vmatprep.mubr.msk.bf16.mxu0 %vm133_vm1, %v132_v0  ;;  %20 = vst.msk [vmem:[#allocation2] sm:$0xff] %vm19_vm0, %v132_v0  ;;  %21 = vst.msk [vmem:[#allocation2 + $0x8] sm:$0xff] %vm19_vm0, %v132_v0  ;;  %v131_v2 = vld [vmem:[%s181_s1 + $0x8] sm:$0xff]  }
   0x2   :  { %121 = vmatpush3.bf16.msra.mxu0 %v130_v1  ;;  %v24_v3 = vld [vmem:[%s182_s0] sm:$0xff]  ;;  %v25_v4 = vld [vmem:[%s182_s0 + $0x8] sm:$0xff] }
   0x3   :  { %122 = vmatprep.subr.bf16.mxu0 %v132_v0  ;;  %v26_v5 = vpack.c.bf16 %v25_v4, %v24_v3  ;;  %v116_v14 = vld [vmem:[%s183_s2] ss:$0 sm:$0xff] }
   0x6   :  { %123 = vmatpush3.bf16.msra.mxu0 %v131_v2 }
   0x8   :  { %v22_v6 = vld [vmem:[#allocation2] sm:$0xff]  ;;  %v23_v8 = vld [vmem:[#allocation2 + $0x8] sm:$0xff] }
   0x9   :  { %125 = vmatmul.mubr.msk.bf16.vlgmr.msra.gmra.mrb[0].mxu0 %vm43_vm2, %v26_v5 }
  0xdc   :  { %v81_v7 = vpop.f32.mrb[0].mxu0 }
  0xdd   :  { %v88_v9 = vadd.f32 %v81_v7, %v22_v6  ;;  %v126_v10 = vpop.f32.mrb[1].mxu0 }
  0xde   :  { %v84_v11 = vpop.f32.mrb[2].mxu0 }
  0xdf   :  { %91 = vst.msk [vmem:[#allocation2] sm:$0xff] %vm19_vm0, %v88_v9  ;;  %v89_v12 = vadd.f32 %v84_v11, %v23_v8  ;;  %v127_v13 = vpop.f32.mrb[3].mxu0 }
  0xe1   :  { %92 = vst.msk [vmem:[#allocation2 + $0x8] sm:$0xff] %vm19_vm0, %v89_v12 }
  0xe6   :  { %v96_v15 = vld [vmem:[#allocation2] sm:$0xff] }
  0xe7   :  { %v105_v16 = vadd.f32 %v116_v14, %v96_v15 }
  0xe8   :  { %v97_v17 = vld [vmem:[#allocation2 + $0x8] sm:$0xff] }
  0xe9   :  { %107 = vst.msk [vmem:[%s184_s3] sm:$0xff] %vm19_vm0, %v105_v16  ;;  %v106_v18 = vadd.f32 %v116_v14, %v97_v17 }
  0xeb   :  { %108 = vst.msk [vmem:[%s184_s3 + $0x8] sm:$0xff] %vm19_vm0, %v106_v18 }

// kernel: decoder_block_forward.15
= control target key start
LH: loop header
LB: loop body
LE: loop exit
PB: predicated region body
PF: predicated region fallthrough
CT: control target
= control target key end

     0   :  { %vm38_vm0 = vcmask 261120   ;;  %s478_s0 = inlined_call_operand.vmem [shape: f32[16,32], index: 0, kind: input, shape index: {}]   ;;  %s479_s1 = inlined_call_operand.vmem [shape: bf16[32,64], index: 1, kind: input, shape index: {}]   ;;  %s480_s2 = inlined_call_operand.vmem [shape: f32[1,64], index: 2, kind: input, shape index: {}]   ;;  %s481_s3 = inlined_call_operand.vmem [shape: bf16[64,32], index: 3, kind: input, shape index: {}]   ;;  %s482_s4 = inlined_call_operand.vmem [shape: f32[1,32], index: 4, kind: input, shape index: {}]   ;;  %s483_s5 = inlined_call_operand.<no memory space> [shape: f32[1,1], index: 5, kind: input, shape index: {}]   ;;  %s484_s6 = inlined_call_operand.<no memory space> [shape: f32[1,1], index: 6, kind: input, shape index: {}]   ;;  %s485_s7 = inlined_call_operand.hbm [shape: f32[16,32], index: 7, kind: output, shape index: {}]  }
   0x1   :  { %v411_v0 = vld [vmem:[%s478_s0] sm:$0xff]  ;;  %v416_v1 = vld [vmem:[%s478_s0 + $0x8] sm:$0xff] }
   0x2   :  { %v39_v2 = vsel %vm38_vm0, %v411_v0, 0.0  ;;  %v42_v3 = vsel %vm38_vm0, %v416_v1, 0.0 }
   0x3   :  { %40 = vadd.xlane.f32.xlu0 %v39_v2 }
   0x4   :  { %14 = vsyncpa [#allocation7], 0  ;;  %v325_v14 = vld [vmem:[%s479_s1] sm:$0xff]   ;;  %v363_v15 = vmov 0.0   ;;  %v326_v16 = vld [vmem:[%s479_s1 + $0x8] sm:$0xff]   ;;  %vm364_vm1 = vmmov 0   ;;  %v75_v35 = vstv %s483_s5  ;;  %v84_v41 = vstv %s484_s6 }
   0x5   :  { %300 = vmatprep.subr.bf16.mxu0 %v363_v15  ;;  %89 = vst.msk [vmem:[#allocation3] sm:$0xff] %vm38_vm0, %v363_v15  ;;  %90 = vst.msk [vmem:[#allocation3 + $0x8] sm:$0xff] %vm38_vm0, %v363_v15  ;;  %308 = vmatprep.subr.bf16.mxu1 %v363_v15  ;;  %v327_v17 = vld [vmem:[%s481_s3] sm:$0xff]   ;;  %v328_v18 = vld [vmem:[%s481_s3 + $0x8] sm:$0xff]   ;;  %vm197_vm6 = vcmask 523264   ;;  %s365_s19 = smov [#allocation6]  }
   0x6   :  { %301 = vmatpush3.bf16.msra.mxu0 %v325_v14  ;;  %304 = vmatprep.mubr.msk.bf16.mxu0 %vm364_vm1, %v363_v15  ;;  %v329_v47 = vld [vmem:[%s481_s3 + $0x10] sm:$0xff]   ;;  %v330_v48 = vld [vmem:[%s481_s3 + $0x18] sm:$0xff]   ;;  %v282_v49 = vld [vmem:[%s480_s2] ss:$0 sm:$0xff]  ;;  %s271_s20 = sshll.u32 %s365_s19, 4  ;;  %s272_s20 = int_to_ptr.vmem [resolvable:$true] %s271_s20 }
   0x7   :  { %43 = vadd.xlane.f32.xlu0 %v42_v3  ;;  %302 = vmatprep.subr.bf16.mxu0 %v363_v15  ;;  %s339_s21 = scalar_lea.vmem %s272_s20, 256  ;;  %p344_p1 = scmp.lt.s32.totalorder %s272_s20, %s272_s20 }
   0x8   :  { %316 = vmatprep.mubr.msk.bf16.mxu1 %vm364_vm1, %v363_v15  ;;  %309 = vmatpush3.bf16.msra.mxu1 %v327_v17  ;;  %p340_p0 = scmp.ne.s32.totalorder %s272_s20, %s339_s21  ;;  %p345_p2 = scmp.lt.s32.totalorder %s339_s21, %s339_s21 }
   0x9   :  { %310 = vmatprep.subr.bf16.mxu1 %v363_v15 }
   0xa   :  { %303 = vmatpush3.bf16.msra.mxu0 %v326_v16  ;;  %p346_p3 = por %p345_p2, %p344_p1 }
   0xc   :  { %311 = vmatpush3.bf16.msra.mxu1 %v328_v18  ;;  %v162_v59 = vld [vmem:[#allocation3] sm:$0xff]  ;;  %v163_v61 = vld [vmem:[#allocation3 + $0x8] sm:$0xff]  ;;  %p347_p4 = pnand %p346_p3, %p340_p0 }
   0xd   :  { %312 = vmatprep.subr.bf16.mxu1 %v363_v15 }
  0x10   :  { %313 = vmatpush3.bf16.msra.mxu1 %v329_v47 }
  0x11   :  { %314 = vmatprep.subr.bf16.mxu1 %v363_v15 }
  0x14   :  { %315 = vmatpush3.bf16.msra.mxu1 %v330_v48 }
  0x90   :  { %v41_v4 = vpop.xlane.xlu0 %40 }
  0x91   :  { %v46_v5 = vmul.f32 0.03125, %v41_v4 }
  0x93   :  { %v48_v6 = vsub.f32 %v411_v0, %v46_v5  ;;  %v291_v5 = vld [vmem:[%s482_s4] ss:$0 sm:$0xff] }
  0x94   :  { %v44_v7 = vpop.xlane.xlu0 %43 }
  0x95   :  { %v47_v8 = vmul.f32 0.03125, %v44_v7  ;;  %v50_v9 = vmul.f32 %v48_v6, %v48_v6  ;;  %v76_v37 = vmul.f32 %v75_v35, %v48_v6 }
  0x97   :  { %v49_v10 = vsub.f32 %v416_v1, %v47_v8  ;;  %v52_v11 = vsel %vm38_vm0, %v50_v9, 0.0 }
  0x98   :  { %53 = vadd.xlane.f32.xlu1 %v52_v11 }
  0x99   :  { %v51_v12 = vmul.f32 %v49_v10, %v49_v10  ;;  %v77_v38 = vmul.f32 %v75_v35, %v49_v10 }
  0x9b   :  { %v55_v13 = vsel %vm38_vm0, %v51_v12, 0.0 }
  0x9c   :  { %56 = vadd.xlane.f32.xlu1 %v55_v13 }
 0x125   :  { %v54_v19 = vpop.xlane.xlu1 %53 }
 0x126   :  { %v59_v20 = vmul.f32 0.032258064, %v54_v19 }
 0x128   :  { %331 = vrsqrt.f32 %v59_v20  ;;  %vm63_vm2 = vcmp.eq.f32.partialorder %v59_v20, inf  ;;  %v66_v25 = vand.u32 2147483648, %v59_v20  ;;  %vm65_vm3 = vcmp.eq.f32.partialorder %v59_v20, 0.0 }
 0x129   :  { %v57_v21 = vpop.xlane.xlu1 %56 }
 0x12a   :  { %v60_v22 = vmul.f32 0.032258064, %v57_v21 }
 0x12c   :  { %333 = vrsqrt.f32 %v60_v22  ;;  %vm70_vm4 = vcmp.eq.f32.partialorder %v60_v22, inf  ;;  %v73_v31 = vand.u32 2147483648, %v60_v22  ;;  %vm72_vm5 = vcmp.eq.f32.partialorder %v60_v22, 0.0 }
 0x132   :  { %v332_v23 = vpop.eup %331 }
 0x133   :  { %v62_v24 = vmul.f32 %v332_v23, %v59_v20 }
 0x135   :  { %v64_v26 = vsel %vm63_vm2, %v59_v20, %v62_v24 }
 0x136   :  { %v334_v27 = vpop.eup %333  ;;  %v67_v28 = vsel %vm65_vm3, %v66_v25, %v64_v26 }
 0x137   :  { %v78_v29 = vadd.f32 1e-06, %v67_v28  ;;  %v69_v30 = vmul.f32 %v334_v27, %v60_v22 }
 0x139   :  { %335 = vrcp.f32 %v78_v29  ;;  %v71_v32 = vsel %vm70_vm4, %v60_v22, %v69_v30 }
 0x13a   :  { %v74_v33 = vsel %vm72_vm5, %v73_v31, %v71_v32 }
 0x13b   :  { %v79_v34 = vadd.f32 1e-06, %v74_v33 }
 0x13d   :  { %337 = vrcp.f32 %v79_v34 }
 0x143   :  { %v336_v36 = vpop.eup %335 }
 0x144   :  { %v81_v39 = vmul.f32 %v336_v36, %v76_v37 }
 0x146   :  { %v85_v43 = vadd.f32 %v84_v41, %v81_v39 }
 0x147   :  { %v338_v40 = vpop.eup %337 }
 0x148   :  { %v83_v42 = vmul.f32 %v338_v40, %v77_v38 }
 0x14a   :  { %v86_v44 = vadd.f32 %v84_v41, %v83_v42 }
 0x14c   :  { %v87_v45 = vpack.c.bf16 %v86_v44, %v85_v43 }
 0x14e   :  { %88 = vst.msk [vmem:[#allocation2] sm:$0xff] %vm38_vm0, %v87_v45 }
 0x155   :  { %v91_v46 = vld [vmem:[#allocation2] sm:$0xff] }
 0x156   :  { %305 = vmatmul.mubr.msk.bf16.vlgmr.msra.gmra.mrb[0].mxu0 %vm38_vm0, %v91_v46 }
 0x229   :  { %v153_v50 = vpop.f32.mrb[0].mxu0 }
 0x22a   :  { %v154_v51 = vadd.f32 %v282_v49, %v153_v50  ;;  %v306_v52 = vpop.f32.mrb[1].mxu0 }
 0x22b   :  { %v156_v53 = vpop.f32.mrb[2].mxu0 }
 0x22c   :  { %v157_v54 = vadd.f32 %v282_v49, %v156_v53  ;;  %v307_v55 = vpop.f32.mrb[3].mxu0  ;;  %v160_v56 = vmax.f32 %v154_v51, 0.0 }
 0x22e   :  { %v161_v57 = vmax.f32 %v157_v54, 0.0 }
 0x230   :  { %v164_v58 = vpack.c.bf16 %v161_v57, %v160_v56 }
 0x232   :  { %317 = vmatmul.mubr.msk.bf16.vlgmr.msra.gmra.mrb[0].mxu1 %vm197_vm6, %v164_v58 }
 0x305   :  { %v235_v60 = vpop.f32.mrb[0].mxu1 }
 0x306   :  { %v242_v62 = vadd.f32 %v235_v60, %v162_v59  ;;  %v318_v63 = vpop.f32.mrb[1].mxu1 }
 0x307   :  { %v238_v2 = vpop.f32.mrb[2].mxu1 }
 0x308   :  { %244 = vst.msk [vmem:[#allocation3] sm:$0xff] %vm38_vm0, %v242_v62  ;;  %v243_v3 = vadd.f32 %v238_v2, %v163_v61  ;;  %v319_v4 = vpop.f32.mrb[3].mxu1 }
 0x30a   :  { %245 = vst.msk [vmem:[#allocation3 + $0x8] sm:$0xff] %vm38_vm0, %v243_v3 }
 0x30f   :  { %v249_v6 = vld [vmem:[#allocation3] sm:$0xff] }
 0x310   :  { %v258_v7 = vadd.f32 %v291_v5, %v249_v6 }
 0x311   :  { %v250_v8 = vld [vmem:[#allocation3 + $0x8] sm:$0xff] }
 0x312   :  { %v259_v9 = vadd.f32 %v291_v5, %v250_v8  ;;  %v262_v10 = vadd.f32 %v258_v7, %v411_v0 }
 0x314   :  { %v263_v11 = vadd.f32 %v259_v9, %v416_v1  ;;  %264 = vst.msk [vmem:[#allocation6] sm:$0xff] %vm38_vm0, %v262_v10 }
 0x316   :  { %265 = vst.msk [vmem:[#allocation6 + $0x8] sm:$0xff] %vm38_vm0, %v263_v11 }
 0x317   :  { %350 = shalt.err (!%p347_p4)
}
 0x318   :  { %s351_s23 = scalar_lea.hbm %s485_s7, 256 }
 0x319   :  { %p352_p5 = scmp.ne.s32.totalorder %s485_s7, %s351_s23  ;;  %p355_p6 = scmp.lt.u32.totalorder %s351_s23, %s485_s7 }
 0x31b   :  { %p357_p7 = pnand %p355_p6, %p352_p5 }
 0x31d   :  { %360 = shalt.err (!%p357_p7)
}
 0x31e   :  { %s366_s0 = smov 128   ;;  %s367_s28 = smov 8  }
 0x31f   :  { %277 = dma.vmem_to_hbm [thread:$0]  %s272_s20, 256, %s485_s7, [#allocation7], %s366_s0, %s366_s0, %s367_s28  }
 0x320   :  { %361 = dma.done.wait [#allocation7], 256  }
 0x321   :  { %362 = vsyncadd [#allocation7], 4294967040 }
 0x322   :  { %281 = vsyncpa [#allocation7], 1 }

</bundles_post_ra>
